<compile_context>
chip_gen: v6e
topology: v6e:2x2x1
jax: 0.10.0
libtpu: 0.0.40
codegen_flags: <defaults>
</compile_context>

<pallas_src>
import functools

import jax
import jax.numpy as jnp
from jax.experimental import pallas as pl
from jax.experimental.pallas import tpu as pltpu

LN_EPS = 1e-5  # PyTorch nn.LayerNorm default


def _layernorm(x, gamma, beta, eps=LN_EPS):
    x = x.astype(jnp.float32)
    mu = jnp.mean(x, axis=-1, keepdims=True)
    xc = x - mu
    var = jnp.mean(xc * xc, axis=-1, keepdims=True)
    return xc * jax.lax.rsqrt(var + eps) * gamma + beta


def _gelu_tanh(x):
    # TODO(synk): PyTorch nn.GELU() defaults to the exact erf form; an erf lowering is
    # not guaranteed inside Mosaic, so the in-kernel FFN GELU uses the tanh approximation.
    c = jnp.float32(0.7978845608028654)  # sqrt(2/pi)
    return 0.5 * x * (1.0 + jnp.tanh(c * (x + 0.044715 * x * x * x)))


def _basic_block_kernel(num_heads, token_tile, kv_chunk,
                        x_ref, mod_ref,
                        n1g_ref, n1b_ref,
                        wq_ref, bq_ref, wk_ref, bk_ref, wv_ref, bv_ref,
                        wo_ref, bo_ref,
                        n2g_ref, n2b_ref,
                        fw1_ref, fb1_ref, fw2_ref, fb2_ref,
                        o_ref,
                        q_scr, k_scr, v_scr, attn_scr):
    N = x_ref.shape[1]
    D = x_ref.shape[2]
    TN = token_tile
    H = num_heads
    hd = D // H

    t = pl.program_id(1)
    row0 = pl.multiple_of(t * TN, TN)

    # Modulation vectors, one per row of the (6, D) block.
    m = mod_ref[0]
    shift_msa, scale_msa, gate_msa = m[0:1, :], m[1:2, :], m[2:3, :]
    shift_mlp, scale_mlp, gate_mlp = m[3:4, :], m[4:5, :], m[5:6, :]

    # ---- Once per batch (t == 0): full-sequence norm1+modulate, Q/K/V GEMMs (M = N, full
    # MXU depth), head-major staging into persistent scratch.  The token axis is
    # "arbitrary", so scratch written here is visible to every later tile of this batch.
    @pl.when(t == 0)
    def _stage_qkv():
        xf = x_ref[0].astype(jnp.float32)                                     # (N, D)
        hf = _layernorm(xf, n1g_ref[...], n1b_ref[...]) * (1.0 + scale_msa) + shift_msa
        hf_b = hf.astype(jnp.bfloat16)
        q = jnp.dot(hf_b, wq_ref[...], preferred_element_type=jnp.float32) + bq_ref[...]
        k = jnp.dot(hf_b, wk_ref[...], preferred_element_type=jnp.float32) + bk_ref[...]
        v = jnp.dot(hf_b, wv_ref[...], preferred_element_type=jnp.float32) + bv_ref[...]
        # Fold the softmax scale into Q once (O(N*D)) instead of the scores (O(H*N*N)).
        q = q * jax.lax.rsqrt(jnp.float32(hd))
        for h in range(H):
            sl = slice(h * hd, (h + 1) * hd)
            q_scr[h] = q[:, sl].astype(jnp.bfloat16)
            k_scr[h] = k[:, sl].astype(jnp.bfloat16)
            v_scr[h] = v[:, sl].astype(jnp.bfloat16)

    # ---- Per token tile --------------------------------------------------------------
    xt = x_ref[0, pl.ds(row0, TN), :].astype(jnp.float32)     # (TN, D) residual slice
    q_t = q_scr[:, pl.ds(row0, TN), :]                        # (H, TN, hd) bf16, pre-scaled

    num_kv = N // kv_chunk
    if num_kv == 1:
        # Small N: single-shot softmax (scores fully materialized is cheap).
        s = jnp.einsum("hqd,hkd->hqk", q_t, k_scr[...],
                       preferred_element_type=jnp.float32)                    # (H, TN, N)
        s_max = jnp.max(s, axis=-1, keepdims=True)
        e = jnp.exp(s - s_max)
        p_attn = e * pl.reciprocal(jnp.sum(e, axis=-1, keepdims=True), approx=True)
        ctx = jnp.einsum("hqk,hkd->hqd", p_attn.astype(jnp.bfloat16), v_scr[...],
                         preferred_element_type=jnp.float32)                  # (H, TN, hd)
    else:
        # Large N: KV-chunked online softmax -> attention intermediates bounded by
        # (H, TN, kv_chunk) regardless of N (keeps v7x's 64 MiB VMEM viable).
        m_i = jnp.full((H, TN, 1), -jnp.inf, jnp.float32)
        l_i = jnp.zeros((H, TN, 1), jnp.float32)
        acc = jnp.zeros((H, TN, hd), jnp.float32)
        for c in range(num_kv):
            c0 = c * kv_chunk
            k_c = k_scr[:, c0:c0 + kv_chunk, :]
            v_c = v_scr[:, c0:c0 + kv_chunk, :]
            s = jnp.einsum("hqd,hkd->hqk", q_t, k_c,
                           preferred_element_type=jnp.float32)
            m_new = jnp.maximum(m_i, jnp.max(s, axis=-1, keepdims=True))
            alpha = jnp.exp(m_i - m_new)
            p_blk = jnp.exp(s - m_new)
            l_i = alpha * l_i + jnp.sum(p_blk, axis=-1, keepdims=True)
            acc = alpha * acc + jnp.einsum("hqk,hkd->hqd",
                                           p_blk.astype(jnp.bfloat16), v_c,
                                           preferred_element_type=jnp.float32)
            m_i = m_new
        ctx = acc * pl.reciprocal(l_i, approx=True)

    # Fused out-projection: lane-scatter heads into a (TN, D) bf16 scratch, then one
    # full-depth (TN, D) @ (D, D) matmul (replaces H matmuls contracting over hd = 32).
    for h in range(H):
        attn_scr[:, h * hd:(h + 1) * hd] = ctx[h].astype(jnp.bfloat16)
    attn = jnp.dot(attn_scr[...], wo_ref[...],
                   preferred_element_type=jnp.float32) + bo_ref[...]

    x1 = xt + gate_msa * attn

    # --- branch 2: x = x + gate_mlp * ffn(modulate(norm2(x), shift_mlp, scale_mlp)) ---
    h2 = _layernorm(x1, n2g_ref[...], n2b_ref[...]) * (1.0 + scale_mlp) + shift_mlp
    f = jnp.dot(h2.astype(jnp.bfloat16), fw1_ref[...],
                preferred_element_type=jnp.float32) + fb1_ref[...]
    f = _gelu_tanh(f)
    f = jnp.dot(f.astype(jnp.bfloat16), fw2_ref[...],
                preferred_element_type=jnp.float32) + fb2_ref[...]
    out = x1 + gate_mlp * f

    o_ref[0] = out.astype(o_ref.dtype)


def _vmem_capacity_bytes():
    try:
        info = pltpu.get_tpu_info()
        cap = getattr(info, "vmem_capacity_bytes", None)
        if cap:
            return int(cap)
    except Exception:
        pass
    return 64 * 1024 * 1024  # conservative fallback (v7x-sized)


def _pick_kv_chunk(N):
    if N <= 1024:
        return N
    for c in (1024, 512, 256, 128):
        if N % c == 0:
            return c
    return N


def basic_block_tf(x, slots, params, num_heads, token_tile=None):
    p = params
    B, N, D = x.shape
    assert D % num_heads == 0
    hd = D // num_heads

    # --- adaLN modulation MLP hoisted to XLA (batched (B,S)@(S,6D), exact erf GELU) ---
    h = slots.astype(jnp.float32) @ p["ada_w1"] + p["ada_b1"]
    h = _layernorm(h, p["ada_g"], p["ada_bb"])
    h = jax.nn.gelu(h, approximate=False)                 # matches nn.GELU() (exact erf)
    mod = h @ p["ada_w2"] + p["ada_b2"]                   # (B, 6D)
    mod = mod.reshape(B, 6, D).astype(jnp.float32)        # one modulation vector per row

    cap = _vmem_capacity_bytes()
    if token_tile is None:
        if N <= 128:
            token_tile = N
        elif cap >= 100 * 1024 * 1024 and N % 256 == 0:
            token_tile = 256                               # v5e/v6e: 128 MiB VMEM
        else:
            token_tile = 128                               # v7x: 64 MiB VMEM
    TN = token_tile
    assert N % TN == 0
    kv_chunk = _pick_kv_chunk(N)

    bf16 = jnp.bfloat16
    weights = [
        p["n1_g"], p["n1_b"],
        p["wq"].astype(bf16), p["bq"],
        p["wk"].astype(bf16), p["bk"],
        p["wv"].astype(bf16), p["bv"],
        p["wo"].astype(bf16), p["bo"],                     # full (D, D) out-proj weight
        p["n2_g"], p["n2_b"],
        p["f_w1"].astype(bf16), p["f_b1"],
        p["f_w2"].astype(bf16), p["f_b2"],
    ]

    # Grid-invariant weights: whole-array VMEM residents (single copy, not pipelined).
    weight_specs = [pl.BlockSpec(memory_space=pltpu.MemorySpace.VMEM) for _ in weights]

    in_specs = [
        # Full sequence; block index constant over the token axis -> DMA'd once per batch.
        pl.BlockSpec((1, N, D), lambda b, t: (b, 0, 0)),
        pl.BlockSpec((1, 6, D), lambda b, t: (b, 0, 0)),   # per-batch modulation block
    ] + weight_specs
    out_specs = pl.BlockSpec((1, TN, D), lambda b, t: (b, t, 0))

    scratch_shapes = [
        pltpu.VMEM((num_heads, N, hd), bf16),   # q (head-major, staged at t==0, pre-scaled)
        pltpu.VMEM((num_heads, N, hd), bf16),   # k
        pltpu.VMEM((num_heads, N, hd), bf16),   # v
        pltpu.VMEM((TN, D), bf16),              # ctx lane-scatter for fused out-proj
    ]

    # --- explicit VMEM budget, clamped to the actual chip (v7x = 64 MiB physical) ---
    def _pad128(n):
        return ((n + 127) // 128) * 128

    weight_bytes = sum(int(w.size) * w.dtype.itemsize for w in weights)
    block_bytes = 2 * 4 * (N * D + 6 * D + TN * D)                     # double-buffered blocks
    scr_bytes = 2 * (3 * num_heads * N * _pad128(hd) + TN * _pad128(D))  # bf16 (lane-padded)
    interm_bytes = 4 * (6 * N * D                                      # t==0 f32 temporaries
                        + 12 * TN * D                                  # per-tile temps
                        + 3 * num_heads * TN * kv_chunk                # scores / probs
                        + 4 * TN * 4 * D)                              # FFN hidden
    est = weight_bytes + block_bytes + scr_bytes + 2 * interm_bytes
    vmem_limit = int(min(max(est, 32 * 1024 * 1024), int(0.85 * cap)))

    # --- cost estimate so XLA can schedule surrounding ops around the custom call ---
    F = 4 * D
    flops = 2 * B * (3 * N * D * D + 2 * N * N * D + N * D * D + 2 * N * D * F)
    transcendentals = B * (num_heads * N * N + N * F + 2 * N)
    bytes_accessed = 2 * B * N * D * 4 + B * 6 * D * 4 + weight_bytes
    cost = pl.CostEstimate(flops=int(flops),
                           transcendentals=int(transcendentals),
                           bytes_accessed=int(bytes_accessed))

    kernel = functools.partial(_basic_block_kernel, num_heads, TN, kv_chunk)
    return pl.pallas_call(
        kernel,
        out_shape=jax.ShapeDtypeStruct((B, N, D), x.dtype),
        grid=(B, N // TN),
        in_specs=in_specs,
        out_specs=out_specs,
        scratch_shapes=scratch_shapes,
        compiler_params=pltpu.CompilerParams(
            # Token axis must be sequential per batch: scratch carries the hoisted
            # Q/K/V staging from the t==0 step to every later tile.
            dimension_semantics=("parallel", "arbitrary"),
            vmem_limit_bytes=vmem_limit,
        ),
        cost_estimate=cost,
    )(x, mod, *weights)


def init_params(key, slot_dim, planes):
    # TODO(synk): TransformerEncoderLayer(planes, planes//32, 0) internals are not in the
    # snippet; assuming standard MHA (q/k/v/out proj with bias) and a Linear->GELU->Linear
    # FFN with hidden = 4*planes.
    D, H6, Fh = planes, 6 * planes, 4 * planes
    ks = jax.random.split(key, 8)

    def w(k, shape):
        return jax.random.normal(k, shape, jnp.float32) * 0.02

    return {
        "ada_w1": w(ks[0], (slot_dim, H6)), "ada_b1": jnp.zeros((1, H6), jnp.float32),
        "ada_g": jnp.ones((1, H6), jnp.float32), "ada_bb": jnp.zeros((1, H6), jnp.float32),
        "ada_w2": w(ks[1], (H6, H6)), "ada_b2": jnp.zeros((1, H6), jnp.float32),
        "n1_g": jnp.ones((1, D), jnp.float32), "n1_b": jnp.zeros((1, D), jnp.float32),
        "wq": w(ks[2], (D, D)), "bq": jnp.zeros((1, D), jnp.float32),
        "wk": w(ks[3], (D, D)), "bk": jnp.zeros((1, D), jnp.float32),
        "wv": w(ks[4], (D, D)), "bv": jnp.zeros((1, D), jnp.float32),
        "wo": w(ks[5], (D, D)), "bo": jnp.zeros((1, D), jnp.float32),
        "n2_g": jnp.ones((1, D), jnp.float32), "n2_b": jnp.zeros((1, D), jnp.float32),
        "f_w1": w(ks[6], (D, Fh)), "f_b1": jnp.zeros((1, Fh), jnp.float32),
        "f_w2": w(ks[7], (Fh, D)), "f_b2": jnp.zeros((1, D), jnp.float32),
    }


def basic_block_tf_ref(x, slots, params, num_heads):
    """Pure-JAX f32 reference (same math; f32 weights, exact div softmax)."""
    p = params
    B, N, D = x.shape
    hd = D // num_heads
    h = slots @ p["ada_w1"] + p["ada_b1"]
    h = _layernorm(h, p["ada_g"], p["ada_bb"])
    h = jax.nn.gelu(h, approximate=False)
    mod = h @ p["ada_w2"] + p["ada_b2"]
    chunks = [mod[:, i * D:(i + 1) * D][:, None, :] for i in range(6)]
    shift_msa, scale_msa, gate_msa, shift_mlp, scale_mlp, gate_mlp = chunks

    h1 = _layernorm(x, p["n1_g"], p["n1_b"]) * (1.0 + scale_msa) + shift_msa
    q = h1 @ p["wq"] + p["bq"]
    k = h1 @ p["wk"] + p["bk"]
    v = h1 @ p["wv"] + p["bv"]
    q = q.reshape(B, N, num_heads, hd).transpose(0, 2, 1, 3)
    k = k.reshape(B, N, num_heads, hd).transpose(0, 2, 1, 3)
    v = v.reshape(B, N, num_heads, hd).transpose(0, 2, 1, 3)
    s = jnp.einsum("bhqd,bhkd->bhqk", q, k) / jnp.sqrt(jnp.float32(hd))
    pr = jax.nn.softmax(s, axis=-1)
    a = jnp.einsum("bhqk,bhkd->bhqd", pr, v).transpose(0, 2, 1, 3).reshape(B, N, D)
    a = a @ p["wo"] + p["bo"]
    x1 = x + gate_msa * a

    h2 = _layernorm(x1, p["n2_g"], p["n2_b"]) * (1.0 + scale_mlp) + shift_mlp
    f = _gelu_tanh(h2 @ p["f_w1"] + p["f_b1"]) @ p["f_w2"] + p["f_b2"]
    return x1 + gate_mlp * f


if __name__ == "__main__":
    # planes=128 keeps D a multiple of 128 (lane-dense output stores, aligned mod chunks)
    # and gives num_heads = planes // 32 = 4 heads of dim 32, as in the PyTorch module.
    B, N, slot_dim, planes = 2, 16, 32, 128
    num_heads = planes // 32

    key = jax.random.PRNGKey(0)
    kx, ks, kp = jax.random.split(key, 3)
    x = jax.random.normal(kx, (B, N, planes), jnp.float32)
    slots = jax.random.normal(ks, (B, slot_dim), jnp.float32)
    params = init_params(kp, slot_dim, planes)

    out = basic_block_tf(x, slots, params, num_heads)
    jax.block_until_ready(out)
    assert out.shape == (B, N, planes)

    ref = basic_block_tf_ref(x, slots, params, num_heads)
    assert jnp.allclose(out, ref, atol=2e-2, rtol=2e-2), "mismatch vs pure-JAX reference"

    print("KERNEL_OK")
</pallas_src>

<mosaic_0001>
module attributes {stable_mosaic.version = 11 : i64} {
  func.func @_basic_block_kernel(%arg0: i32, %arg1: i32, %arg2: memref<1x16x128xf32, #tpu.memory_space<vmem>>, %arg3: memref<1x6x128xf32, #tpu.memory_space<vmem>>, %arg4: memref<1x128xf32, #tpu.memory_space<vmem>>, %arg5: memref<1x128xf32, #tpu.memory_space<vmem>>, %arg6: memref<128x128xbf16, #tpu.memory_space<vmem>>, %arg7: memref<1x128xf32, #tpu.memory_space<vmem>>, %arg8: memref<128x128xbf16, #tpu.memory_space<vmem>>, %arg9: memref<1x128xf32, #tpu.memory_space<vmem>>, %arg10: memref<128x128xbf16, #tpu.memory_space<vmem>>, %arg11: memref<1x128xf32, #tpu.memory_space<vmem>>, %arg12: memref<128x128xbf16, #tpu.memory_space<vmem>>, %arg13: memref<1x128xf32, #tpu.memory_space<vmem>>, %arg14: memref<1x128xf32, #tpu.memory_space<vmem>>, %arg15: memref<1x128xf32, #tpu.memory_space<vmem>>, %arg16: memref<128x512xbf16, #tpu.memory_space<vmem>>, %arg17: memref<1x512xf32, #tpu.memory_space<vmem>>, %arg18: memref<512x128xbf16, #tpu.memory_space<vmem>>, %arg19: memref<1x128xf32, #tpu.memory_space<vmem>>, %arg20: memref<1x16x128xf32, #tpu.memory_space<vmem>>, %arg21: memref<4x16x32xbf16, #tpu.memory_space<vmem>>, %arg22: memref<4x16x32xbf16, #tpu.memory_space<vmem>>, %arg23: memref<4x16x32xbf16, #tpu.memory_space<vmem>>, %arg24: memref<16x128xbf16, #tpu.memory_space<vmem>>) attributes {dimension_semantics = [#tpu.dimension_semantics<parallel>, #tpu.dimension_semantics<arbitrary>], iteration_bounds = array<i64: 2, 1>, scalar_prefetch = 0 : i64, scratch_operands = 4 : i64, tpu.core_type = #tpu.core_type<tc>, window_params = [{transform_indices = @transform_0, window_bounds = array<i64: 1, 16, 128>}, {transform_indices = @transform_1, window_bounds = array<i64: 1, 6, 128>}, {pipeline_mode = #tpu.pipeline_mode<synchronous>, transform_indices = @transform_2, window_bounds = array<i64: 1, 128>}, {pipeline_mode = #tpu.pipeline_mode<synchronous>, transform_indices = @transform_3, window_bounds = array<i64: 1, 128>}, {pipeline_mode = #tpu.pipeline_mode<synchronous>, transform_indices = @transform_4, window_bounds = array<i64: 128, 128>}, {pipeline_mode = #tpu.pipeline_mode<synchronous>, transform_indices = @transform_5, window_bounds = array<i64: 1, 128>}, {pipeline_mode = #tpu.pipeline_mode<synchronous>, transform_indices = @transform_6, window_bounds = array<i64: 128, 128>}, {pipeline_mode = #tpu.pipeline_mode<synchronous>, transform_indices = @transform_7, window_bounds = array<i64: 1, 128>}, {pipeline_mode = #tpu.pipeline_mode<synchronous>, transform_indices = @transform_8, window_bounds = array<i64: 128, 128>}, {pipeline_mode = #tpu.pipeline_mode<synchronous>, transform_indices = @transform_9, window_bounds = array<i64: 1, 128>}, {pipeline_mode = #tpu.pipeline_mode<synchronous>, transform_indices = @transform_10, window_bounds = array<i64: 128, 128>}, {pipeline_mode = #tpu.pipeline_mode<synchronous>, transform_indices = @transform_11, window_bounds = array<i64: 1, 128>}, {pipeline_mode = #tpu.pipeline_mode<synchronous>, transform_indices = @transform_12, window_bounds = array<i64: 1, 128>}, {pipeline_mode = #tpu.pipeline_mode<synchronous>, transform_indices = @transform_13, window_bounds = array<i64: 1, 128>}, {pipeline_mode = #tpu.pipeline_mode<synchronous>, transform_indices = @transform_14, window_bounds = array<i64: 128, 512>}, {pipeline_mode = #tpu.pipeline_mode<synchronous>, transform_indices = @transform_15, window_bounds = array<i64: 1, 512>}, {pipeline_mode = #tpu.pipeline_mode<synchronous>, transform_indices = @transform_16, window_bounds = array<i64: 512, 128>}, {pipeline_mode = #tpu.pipeline_mode<synchronous>, transform_indices = @transform_17, window_bounds = array<i64: 1, 128>}, {transform_indices = @transform_18, window_bounds = array<i64: 1, 16, 128>}]} {
    %c16_i32 = arith.constant 16 : i32
    %0 = arith.muli %arg1, %c16_i32 : i32
    %1 = tpu.assume_multiple %0, 16 : i32
    %c0 = arith.constant 0 : index
    %c0_0 = arith.constant 0 : index
    %c0_1 = arith.constant 0 : index
    %2 = vector.load %arg3[%c0, %c0_0, %c0_1] : memref<1x6x128xf32, #tpu.memory_space<vmem>>, vector<1x6x128xf32>
    %3 = vector.shape_cast %2 : vector<1x6x128xf32> to vector<6x128xf32>
    %4 = vector.extract_strided_slice %3 {offsets = [0, 0], sizes = [1, 128], strides = [1, 1]} : vector<6x128xf32> to vector<1x128xf32>
    %5 = vector.extract_strided_slice %3 {offsets = [1, 0], sizes = [1, 128], strides = [1, 1]} : vector<6x128xf32> to vector<1x128xf32>
    %6 = vector.extract_strided_slice %3 {offsets = [2, 0], sizes = [1, 128], strides = [1, 1]} : vector<6x128xf32> to vector<1x128xf32>
    %7 = vector.extract_strided_slice %3 {offsets = [3, 0], sizes = [1, 128], strides = [1, 1]} : vector<6x128xf32> to vector<1x128xf32>
    %8 = vector.extract_strided_slice %3 {offsets = [4, 0], sizes = [1, 128], strides = [1, 1]} : vector<6x128xf32> to vector<1x128xf32>
    %9 = vector.extract_strided_slice %3 {offsets = [5, 0], sizes = [1, 128], strides = [1, 1]} : vector<6x128xf32> to vector<1x128xf32>
    %c0_i32 = arith.constant 0 : i32
    %10 = arith.cmpi eq, %arg1, %c0_i32 : i32
    %11 = arith.extui %10 : i1 to i32
    %c0_i32_2 = arith.constant 0 : i32
    %12 = arith.cmpi ne, %11, %c0_i32_2 : i32
    scf.if %12 {
      %c0_55 = arith.constant 0 : index
      %c0_56 = arith.constant 0 : index
      %c0_57 = arith.constant 0 : index
      %117 = vector.load %arg2[%c0_55, %c0_56, %c0_57] : memref<1x16x128xf32, #tpu.memory_space<vmem>>, vector<1x16x128xf32>
      %118 = vector.shape_cast %117 : vector<1x16x128xf32> to vector<16x128xf32>
      %c0_58 = arith.constant 0 : index
      %c0_59 = arith.constant 0 : index
      %119 = vector.load %arg4[%c0_58, %c0_59] : memref<1x128xf32, #tpu.memory_space<vmem>>, vector<1x128xf32>
      %c0_60 = arith.constant 0 : index
      %c0_61 = arith.constant 0 : index
      %120 = vector.load %arg5[%c0_60, %c0_61] : memref<1x128xf32, #tpu.memory_space<vmem>>, vector<1x128xf32>
      %cst_62 = arith.constant dense<0.000000e+00> : vector<16xf32>
      %121 = vector.multi_reduction <add>, %118, %cst_62 [1] : vector<16x128xf32> to vector<16xf32>
      %122 = vector.shape_cast %121 : vector<16xf32> to vector<16x1xf32>
      %cst_63 = arith.constant 1.280000e+02 : f32
      %123 = vector.broadcast %cst_63 : f32 to vector<16x1xf32>
      %124 = arith.divf %122, %123 : vector<16x1xf32>
      %125 = vector.broadcast %124 : vector<16x1xf32> to vector<16x128xf32>
      %126 = arith.subf %118, %125 : vector<16x128xf32>
      %127 = arith.mulf %126, %126 : vector<16x128xf32>
      %cst_64 = arith.constant dense<0.000000e+00> : vector<16xf32>
      %128 = vector.multi_reduction <add>, %127, %cst_64 [1] : vector<16x128xf32> to vector<16xf32>
      %129 = vector.shape_cast %128 : vector<16xf32> to vector<16x1xf32>
      %cst_65 = arith.constant 1.280000e+02 : f32
      %130 = vector.broadcast %cst_65 : f32 to vector<16x1xf32>
      %131 = arith.divf %129, %130 : vector<16x1xf32>
      %cst_66 = arith.constant 9.99999974E-6 : f32
      %132 = vector.broadcast %cst_66 : f32 to vector<16x1xf32>
      %133 = arith.addf %131, %132 : vector<16x1xf32>
      %134 = math.rsqrt %133 : vector<16x1xf32>
      %135 = vector.broadcast %134 : vector<16x1xf32> to vector<16x128xf32>
      %136 = arith.mulf %126, %135 : vector<16x128xf32>
      %137 = vector.broadcast %119 : vector<1x128xf32> to vector<16x128xf32>
      %138 = arith.mulf %136, %137 : vector<16x128xf32>
      %139 = vector.broadcast %120 : vector<1x128xf32> to vector<16x128xf32>
      %140 = arith.addf %138, %139 : vector<16x128xf32>
      %cst_67 = arith.constant 1.000000e+00 : f32
      %141 = vector.broadcast %cst_67 : f32 to vector<1x128xf32>
      %142 = arith.addf %141, %5 : vector<1x128xf32>
      %143 = vector.broadcast %142 : vector<1x128xf32> to vector<16x128xf32>
      %144 = arith.mulf %140, %143 : vector<16x128xf32>
      %145 = vector.broadcast %4 : vector<1x128xf32> to vector<16x128xf32>
      %146 = arith.addf %144, %145 : vector<16x128xf32>
      %147 = arith.truncf %146 : vector<16x128xf32> to vector<16x128xbf16>
      %c0_68 = arith.constant 0 : index
      %c0_69 = arith.constant 0 : index
      %148 = vector.load %arg6[%c0_68, %c0_69] : memref<128x128xbf16, #tpu.memory_space<vmem>>, vector<128x128xbf16>
      %cst_70 = arith.constant dense<0.000000e+00> : vector<16x128xf32>
      %149 = tpu.matmul %147, %148, %cst_70 {dimension_numbers = #tpu.dot_dimension_numbers<[1], [0], [0], [1], [0, 0, 1, 1], [], []>} : vector<16x128xbf16>, vector<128x128xbf16>, vector<16x128xf32> -> vector<16x128xf32>
      %c0_71 = arith.constant 0 : index
      %c0_72 = arith.constant 0 : index
      %150 = vector.load %arg7[%c0_71, %c0_72] : memref<1x128xf32, #tpu.memory_space<vmem>>, vector<1x128xf32>
      %151 = vector.broadcast %150 : vector<1x128xf32> to vector<16x128xf32>
      %152 = arith.addf %149, %151 : vector<16x128xf32>
      %c0_73 = arith.constant 0 : index
      %c0_74 = arith.constant 0 : index
      %153 = vector.load %arg8[%c0_73, %c0_74] : memref<128x128xbf16, #tpu.memory_space<vmem>>, vector<128x128xbf16>
      %cst_75 = arith.constant dense<0.000000e+00> : vector<16x128xf32>
      %154 = tpu.matmul %147, %153, %cst_75 {dimension_numbers = #tpu.dot_dimension_numbers<[1], [0], [0], [1], [0, 0, 1, 1], [], []>} : vector<16x128xbf16>, vector<128x128xbf16>, vector<16x128xf32> -> vector<16x128xf32>
      %c0_76 = arith.constant 0 : index
      %c0_77 = arith.constant 0 : index
      %155 = vector.load %arg9[%c0_76, %c0_77] : memref<1x128xf32, #tpu.memory_space<vmem>>, vector<1x128xf32>
      %156 = vector.broadcast %155 : vector<1x128xf32> to vector<16x128xf32>
      %157 = arith.addf %154, %156 : vector<16x128xf32>
      %c0_78 = arith.constant 0 : index
      %c0_79 = arith.constant 0 : index
      %158 = vector.load %arg10[%c0_78, %c0_79] : memref<128x128xbf16, #tpu.memory_space<vmem>>, vector<128x128xbf16>
      %cst_80 = arith.constant dense<0.000000e+00> : vector<16x128xf32>
      %159 = tpu.matmul %147, %158, %cst_80 {dimension_numbers = #tpu.dot_dimension_numbers<[1], [0], [0], [1], [0, 0, 1, 1], [], []>} : vector<16x128xbf16>, vector<128x128xbf16>, vector<16x128xf32> -> vector<16x128xf32>
      %c0_81 = arith.constant 0 : index
      %c0_82 = arith.constant 0 : index
      %160 = vector.load %arg11[%c0_81, %c0_82] : memref<1x128xf32, #tpu.memory_space<vmem>>, vector<1x128xf32>
      %161 = vector.broadcast %160 : vector<1x128xf32> to vector<16x128xf32>
      %162 = arith.addf %159, %161 : vector<16x128xf32>
      %cst_83 = arith.constant 3.200000e+01 : f32
      %163 = math.rsqrt %cst_83 : f32
      %164 = vector.broadcast %163 : f32 to vector<16x128xf32>
      %165 = arith.mulf %152, %164 : vector<16x128xf32>
      %166 = vector.extract_strided_slice %165 {offsets = [0, 0], sizes = [16, 32], strides = [1, 1]} : vector<16x128xf32> to vector<16x32xf32>
      %167 = arith.truncf %166 : vector<16x32xf32> to vector<16x32xbf16>
      %c0_84 = arith.constant 0 : index
      %c0_85 = arith.constant 0 : index
      %c0_86 = arith.constant 0 : index
      %168 = vector.load %arg21[%c0_84, %c0_85, %c0_86] : memref<4x16x32xbf16, #tpu.memory_space<vmem>>, vector<1x16x32xbf16>
      %169 = vector.shape_cast %168 : vector<1x16x32xbf16> to vector<16x32xbf16>
      %170 = vector.shape_cast %167 : vector<16x32xbf16> to vector<1x16x32xbf16>
      tpu.vector_store %arg21[%c0_84, %c0_85, %c0_86], %170 {strides = array<i32>} : memref<4x16x32xbf16, #tpu.memory_space<vmem>>, vector<1x16x32xbf16>,
      %171 = vector.extract_strided_slice %157 {offsets = [0, 0], sizes = [16, 32], strides = [1, 1]} : vector<16x128xf32> to vector<16x32xf32>
      %172 = arith.truncf %171 : vector<16x32xf32> to vector<16x32xbf16>
      %c0_87 = arith.constant 0 : index
      %c0_88 = arith.constant 0 : index
      %c0_89 = arith.constant 0 : index
      %173 = vector.load %arg22[%c0_87, %c0_88, %c0_89] : memref<4x16x32xbf16, #tpu.memory_space<vmem>>, vector<1x16x32xbf16>
      %174 = vector.shape_cast %173 : vector<1x16x32xbf16> to vector<16x32xbf16>
      %175 = vector.shape_cast %172 : vector<16x32xbf16> to vector<1x16x32xbf16>
      tpu.vector_store %arg22[%c0_87, %c0_88, %c0_89], %175 {strides = array<i32>} : memref<4x16x32xbf16, #tpu.memory_space<vmem>>, vector<1x16x32xbf16>,
      %176 = vector.extract_strided_slice %162 {offsets = [0, 0], sizes = [16, 32], strides = [1, 1]} : vector<16x128xf32> to vector<16x32xf32>
      %177 = arith.truncf %176 : vector<16x32xf32> to vector<16x32xbf16>
      %c0_90 = arith.constant 0 : index
      %c0_91 = arith.constant 0 : index
      %c0_92 = arith.constant 0 : index
      %178 = vector.load %arg23[%c0_90, %c0_91, %c0_92] : memref<4x16x32xbf16, #tpu.memory_space<vmem>>, vector<1x16x32xbf16>
      %179 = vector.shape_cast %178 : vector<1x16x32xbf16> to vector<16x32xbf16>
      %180 = vector.shape_cast %177 : vector<16x32xbf16> to vector<1x16x32xbf16>
      tpu.vector_store %arg23[%c0_90, %c0_91, %c0_92], %180 {strides = array<i32>} : memref<4x16x32xbf16, #tpu.memory_space<vmem>>, vector<1x16x32xbf16>,
      %181 = vector.extract_strided_slice %165 {offsets = [0, 32], sizes = [16, 32], strides = [1, 1]} : vector<16x128xf32> to vector<16x32xf32>
      %182 = arith.truncf %181 : vector<16x32xf32> to vector<16x32xbf16>
      %c1 = arith.constant 1 : index
      %c0_93 = arith.constant 0 : index
      %c0_94 = arith.constant 0 : index
      %183 = vector.load %arg21[%c1, %c0_93, %c0_94] : memref<4x16x32xbf16, #tpu.memory_space<vmem>>, vector<1x16x32xbf16>
      %184 = vector.shape_cast %183 : vector<1x16x32xbf16> to vector<16x32xbf16>
      %185 = vector.shape_cast %182 : vector<16x32xbf16> to vector<1x16x32xbf16>
      tpu.vector_store %arg21[%c1, %c0_93, %c0_94], %185 {strides = array<i32>} : memref<4x16x32xbf16, #tpu.memory_space<vmem>>, vector<1x16x32xbf16>,
      %186 = vector.extract_strided_slice %157 {offsets = [0, 32], sizes = [16, 32], strides = [1, 1]} : vector<16x128xf32> to vector<16x32xf32>
      %187 = arith.truncf %186 : vector<16x32xf32> to vector<16x32xbf16>
      %c1_95 = arith.constant 1 : index
      %c0_96 = arith.constant 0 : index
      %c0_97 = arith.constant 0 : index
      %188 = vector.load %arg22[%c1_95, %c0_96, %c0_97] : memref<4x16x32xbf16, #tpu.memory_space<vmem>>, vector<1x16x32xbf16>
      %189 = vector.shape_cast %188 : vector<1x16x32xbf16> to vector<16x32xbf16>
      %190 = vector.shape_cast %187 : vector<16x32xbf16> to vector<1x16x32xbf16>
      tpu.vector_store %arg22[%c1_95, %c0_96, %c0_97], %190 {strides = array<i32>} : memref<4x16x32xbf16, #tpu.memory_space<vmem>>, vector<1x16x32xbf16>,
      %191 = vector.extract_strided_slice %162 {offsets = [0, 32], sizes = [16, 32], strides = [1, 1]} : vector<16x128xf32> to vector<16x32xf32>
      %192 = arith.truncf %191 : vector<16x32xf32> to vector<16x32xbf16>
      %c1_98 = arith.constant 1 : index
      %c0_99 = arith.constant 0 : index
      %c0_100 = arith.constant 0 : index
      %193 = vector.load %arg23[%c1_98, %c0_99, %c0_100] : memref<4x16x32xbf16, #tpu.memory_space<vmem>>, vector<1x16x32xbf16>
      %194 = vector.shape_cast %193 : vector<1x16x32xbf16> to vector<16x32xbf16>
      %195 = vector.shape_cast %192 : vector<16x32xbf16> to vector<1x16x32xbf16>
      tpu.vector_store %arg23[%c1_98, %c0_99, %c0_100], %195 {strides = array<i32>} : memref<4x16x32xbf16, #tpu.memory_space<vmem>>, vector<1x16x32xbf16>,
      %196 = vector.extract_strided_slice %165 {offsets = [0, 64], sizes = [16, 32], strides = [1, 1]} : vector<16x128xf32> to vector<16x32xf32>
      %197 = arith.truncf %196 : vector<16x32xf32> to vector<16x32xbf16>
      %c2 = arith.constant 2 : index
      %c0_101 = arith.constant 0 : index
      %c0_102 = arith.constant 0 : index
      %198 = vector.load %arg21[%c2, %c0_101, %c0_102] : memref<4x16x32xbf16, #tpu.memory_space<vmem>>, vector<1x16x32xbf16>
      %199 = vector.shape_cast %198 : vector<1x16x32xbf16> to vector<16x32xbf16>
      %200 = vector.shape_cast %197 : vector<16x32xbf16> to vector<1x16x32xbf16>
      tpu.vector_store %arg21[%c2, %c0_101, %c0_102], %200 {strides = array<i32>} : memref<4x16x32xbf16, #tpu.memory_space<vmem>>, vector<1x16x32xbf16>,
      %201 = vector.extract_strided_slice %157 {offsets = [0, 64], sizes = [16, 32], strides = [1, 1]} : vector<16x128xf32> to vector<16x32xf32>
      %202 = arith.truncf %201 : vector<16x32xf32> to vector<16x32xbf16>
      %c2_103 = arith.constant 2 : index
      %c0_104 = arith.constant 0 : index
      %c0_105 = arith.constant 0 : index
      %203 = vector.load %arg22[%c2_103, %c0_104, %c0_105] : memref<4x16x32xbf16, #tpu.memory_space<vmem>>, vector<1x16x32xbf16>
      %204 = vector.shape_cast %203 : vector<1x16x32xbf16> to vector<16x32xbf16>
      %205 = vector.shape_cast %202 : vector<16x32xbf16> to vector<1x16x32xbf16>
      tpu.vector_store %arg22[%c2_103, %c0_104, %c0_105], %205 {strides = array<i32>} : memref<4x16x32xbf16, #tpu.memory_space<vmem>>, vector<1x16x32xbf16>,
      %206 = vector.extract_strided_slice %162 {offsets = [0, 64], sizes = [16, 32], strides = [1, 1]} : vector<16x128xf32> to vector<16x32xf32>
      %207 = arith.truncf %206 : vector<16x32xf32> to vector<16x32xbf16>
      %c2_106 = arith.constant 2 : index
      %c0_107 = arith.constant 0 : index
      %c0_108 = arith.constant 0 : index
      %208 = vector.load %arg23[%c2_106, %c0_107, %c0_108] : memref<4x16x32xbf16, #tpu.memory_space<vmem>>, vector<1x16x32xbf16>
      %209 = vector.shape_cast %208 : vector<1x16x32xbf16> to vector<16x32xbf16>
      %210 = vector.shape_cast %207 : vector<16x32xbf16> to vector<1x16x32xbf16>
      tpu.vector_store %arg23[%c2_106, %c0_107, %c0_108], %210 {strides = array<i32>} : memref<4x16x32xbf16, #tpu.memory_space<vmem>>, vector<1x16x32xbf16>,
      %211 = vector.extract_strided_slice %165 {offsets = [0, 96], sizes = [16, 32], strides = [1, 1]} : vector<16x128xf32> to vector<16x32xf32>
      %212 = arith.truncf %211 : vector<16x32xf32> to vector<16x32xbf16>
      %c3 = arith.constant 3 : index
      %c0_109 = arith.constant 0 : index
      %c0_110 = arith.constant 0 : index
      %213 = vector.load %arg21[%c3, %c0_109, %c0_110] : memref<4x16x32xbf16, #tpu.memory_space<vmem>>, vector<1x16x32xbf16>
      %214 = vector.shape_cast %213 : vector<1x16x32xbf16> to vector<16x32xbf16>
      %215 = vector.shape_cast %212 : vector<16x32xbf16> to vector<1x16x32xbf16>
      tpu.vector_store %arg21[%c3, %c0_109, %c0_110], %215 {strides = array<i32>} : memref<4x16x32xbf16, #tpu.memory_space<vmem>>, vector<1x16x32xbf16>,
      %216 = vector.extract_strided_slice %157 {offsets = [0, 96], sizes = [16, 32], strides = [1, 1]} : vector<16x128xf32> to vector<16x32xf32>
      %217 = arith.truncf %216 : vector<16x32xf32> to vector<16x32xbf16>
      %c3_111 = arith.constant 3 : index
      %c0_112 = arith.constant 0 : index
      %c0_113 = arith.constant 0 : index
      %218 = vector.load %arg22[%c3_111, %c0_112, %c0_113] : memref<4x16x32xbf16, #tpu.memory_space<vmem>>, vector<1x16x32xbf16>
      %219 = vector.shape_cast %218 : vector<1x16x32xbf16> to vector<16x32xbf16>
      %220 = vector.shape_cast %217 : vector<16x32xbf16> to vector<1x16x32xbf16>
      tpu.vector_store %arg22[%c3_111, %c0_112, %c0_113], %220 {strides = array<i32>} : memref<4x16x32xbf16, #tpu.memory_space<vmem>>, vector<1x16x32xbf16>,
      %221 = vector.extract_strided_slice %162 {offsets = [0, 96], sizes = [16, 32], strides = [1, 1]} : vector<16x128xf32> to vector<16x32xf32>
      %222 = arith.truncf %221 : vector<16x32xf32> to vector<16x32xbf16>
      %c3_114 = arith.constant 3 : index
      %c0_115 = arith.constant 0 : index
      %c0_116 = arith.constant 0 : index
      %223 = vector.load %arg23[%c3_114, %c0_115, %c0_116] : memref<4x16x32xbf16, #tpu.memory_space<vmem>>, vector<1x16x32xbf16>
      %224 = vector.shape_cast %223 : vector<1x16x32xbf16> to vector<16x32xbf16>
      %225 = vector.shape_cast %222 : vector<16x32xbf16> to vector<1x16x32xbf16>
      tpu.vector_store %arg23[%c3_114, %c0_115, %c0_116], %225 {strides = array<i32>} : memref<4x16x32xbf16, #tpu.memory_space<vmem>>, vector<1x16x32xbf16>,
    } else {
    }
    %c0_3 = arith.constant 0 : index
    %13 = arith.index_cast %1 : i32 to index
    %c0_4 = arith.constant 0 : index
    %14 = vector.load %arg2[%c0_3, %13, %c0_4] : memref<1x16x128xf32, #tpu.memory_space<vmem>>, vector<1x16x128xf32>
    %15 = vector.shape_cast %14 : vector<1x16x128xf32> to vector<16x128xf32>
    %c0_5 = arith.constant 0 : index
    %16 = arith.index_cast %1 : i32 to index
    %c0_6 = arith.constant 0 : index
    %17 = vector.load %arg21[%c0_5, %16, %c0_6] : memref<4x16x32xbf16, #tpu.memory_space<vmem>>, vector<4x16x32xbf16>
    %c0_7 = arith.constant 0 : index
    %c0_8 = arith.constant 0 : index
    %c0_9 = arith.constant 0 : index
    %18 = vector.load %arg22[%c0_7, %c0_8, %c0_9] : memref<4x16x32xbf16, #tpu.memory_space<vmem>>, vector<4x16x32xbf16>
    "tpu.trace_start"() <{level = 10 : i32, message = "hqd,hkd->hqk"}> : () -> ()
    %cst = arith.constant dense<0.000000e+00> : vector<4x16x16xf32>
    %19 = tpu.matmul %17, %18, %cst {dimension_numbers = #tpu.dot_dimension_numbers<[2], [2], [1], [1], [0, 0, 0, 1, 1, 1], [0], [0]>} : vector<4x16x32xbf16>, vector<4x16x32xbf16>, vector<4x16x16xf32> -> vector<4x16x16xf32>
    "tpu.trace_stop"() : () -> ()
    %cst_10 = arith.constant dense<0xFF800000> : vector<4x16xf32>
    %20 = vector.multi_reduction <maximumf>, %19, %cst_10 [2] : vector<4x16x16xf32> to vector<4x16xf32>
    %21 = vector.shape_cast %20 : vector<4x16xf32> to vector<4x16x1xf32>
    %22 = vector.broadcast %21 : vector<4x16x1xf32> to vector<4x16x16xf32>
    %23 = arith.subf %19, %22 : vector<4x16x16xf32>
    %24 = math.exp %23 : vector<4x16x16xf32>
    %cst_11 = arith.constant dense<0.000000e+00> : vector<4x16xf32>
    %25 = vector.multi_reduction <add>, %24, %cst_11 [2] : vector<4x16x16xf32> to vector<4x16xf32>
    %26 = vector.shape_cast %25 : vector<4x16xf32> to vector<4x16x1xf32>
    %27 = tpu.reciprocal %26 {approx = true} : vector<4x16x1xf32> -> vector<4x16x1xf32>
    %28 = vector.broadcast %27 : vector<4x16x1xf32> to vector<4x16x16xf32>
    %29 = arith.mulf %24, %28 : vector<4x16x16xf32>
    %30 = arith.truncf %29 : vector<4x16x16xf32> to vector<4x16x16xbf16>
    %c0_12 = arith.constant 0 : index
    %c0_13 = arith.constant 0 : index
    %c0_14 = arith.constant 0 : index
    %31 = vector.load %arg23[%c0_12, %c0_13, %c0_14] : memref<4x16x32xbf16, #tpu.memory_space<vmem>>, vector<4x16x32xbf16>
    "tpu.trace_start"() <{level = 10 : i32, message = "hqk,hkd->hqd"}> : () -> ()
    %cst_15 = arith.constant dense<0.000000e+00> : vector<4x16x32xf32>
    %32 = tpu.matmul %30, %31, %cst_15 {dimension_numbers = #tpu.dot_dimension_numbers<[2], [1], [1], [2], [0, 0, 0, 1, 1, 2], [0], [0]>} : vector<4x16x16xbf16>, vector<4x16x32xbf16>, vector<4x16x32xf32> -> vector<4x16x32xf32>
    "tpu.trace_stop"() : () -> ()
    %33 = vector.extract_strided_slice %32 {offsets = [0, 0, 0], sizes = [1, 16, 32], strides = [1, 1, 1]} : vector<4x16x32xf32> to vector<1x16x32xf32>
    %34 = vector.shape_cast %33 : vector<1x16x32xf32> to vector<16x32xf32>
    %35 = arith.truncf %34 : vector<16x32xf32> to vector<16x32xbf16>
    %c0_16 = arith.constant 0 : index
    %c0_17 = arith.constant 0 : index
    %36 = vector.load %arg24[%c0_16, %c0_17] : memref<16x128xbf16, #tpu.memory_space<vmem>>, vector<16x32xbf16>
    tpu.vector_store %arg24[%c0_16, %c0_17], %35 {strides = array<i32>} : memref<16x128xbf16, #tpu.memory_space<vmem>>, vector<16x32xbf16>,
    %37 = vector.extract_strided_slice %32 {offsets = [1, 0, 0], sizes = [1, 16, 32], strides = [1, 1, 1]} : vector<4x16x32xf32> to vector<1x16x32xf32>
    %38 = vector.shape_cast %37 : vector<1x16x32xf32> to vector<16x32xf32>
    %39 = arith.truncf %38 : vector<16x32xf32> to vector<16x32xbf16>
    %c0_18 = arith.constant 0 : index
    %c32 = arith.constant 32 : index
    %40 = vector.load %arg24[%c0_18, %c32] : memref<16x128xbf16, #tpu.memory_space<vmem>>, vector<16x32xbf16>
    tpu.vector_store %arg24[%c0_18, %c32], %39 {strides = array<i32>} : memref<16x128xbf16, #tpu.memory_space<vmem>>, vector<16x32xbf16>,
    %41 = vector.extract_strided_slice %32 {offsets = [2, 0, 0], sizes = [1, 16, 32], strides = [1, 1, 1]} : vector<4x16x32xf32> to vector<1x16x32xf32>
    %42 = vector.shape_cast %41 : vector<1x16x32xf32> to vector<16x32xf32>
    %43 = arith.truncf %42 : vector<16x32xf32> to vector<16x32xbf16>
    %c0_19 = arith.constant 0 : index
    %c64 = arith.constant 64 : index
    %44 = vector.load %arg24[%c0_19, %c64] : memref<16x128xbf16, #tpu.memory_space<vmem>>, vector<16x32xbf16>
    tpu.vector_store %arg24[%c0_19, %c64], %43 {strides = array<i32>} : memref<16x128xbf16, #tpu.memory_space<vmem>>, vector<16x32xbf16>,
    %45 = vector.extract_strided_slice %32 {offsets = [3, 0, 0], sizes = [1, 16, 32], strides = [1, 1, 1]} : vector<4x16x32xf32> to vector<1x16x32xf32>
    %46 = vector.shape_cast %45 : vector<1x16x32xf32> to vector<16x32xf32>
    %47 = arith.truncf %46 : vector<16x32xf32> to vector<16x32xbf16>
    %c0_20 = arith.constant 0 : index
    %c96 = arith.constant 96 : index
    %48 = vector.load %arg24[%c0_20, %c96] : memref<16x128xbf16, #tpu.memory_space<vmem>>, vector<16x32xbf16>
    tpu.vector_store %arg24[%c0_20, %c96], %47 {strides = array<i32>} : memref<16x128xbf16, #tpu.memory_space<vmem>>, vector<16x32xbf16>,
    %c0_21 = arith.constant 0 : index
    %c0_22 = arith.constant 0 : index
    %49 = vector.load %arg24[%c0_21, %c0_22] : memref<16x128xbf16, #tpu.memory_space<vmem>>, vector<16x128xbf16>
    %c0_23 = arith.constant 0 : index
    %c0_24 = arith.constant 0 : index
    %50 = vector.load %arg12[%c0_23, %c0_24] : memref<128x128xbf16, #tpu.memory_space<vmem>>, vector<128x128xbf16>
    %cst_25 = arith.constant dense<0.000000e+00> : vector<16x128xf32>
    %51 = tpu.matmul %49, %50, %cst_25 {dimension_numbers = #tpu.dot_dimension_numbers<[1], [0], [0], [1], [0, 0, 1, 1], [], []>} : vector<16x128xbf16>, vector<128x128xbf16>, vector<16x128xf32> -> vector<16x128xf32>
    %c0_26 = arith.constant 0 : index
    %c0_27 = arith.constant 0 : index
    %52 = vector.load %arg13[%c0_26, %c0_27] : memref<1x128xf32, #tpu.memory_space<vmem>>, vector<1x128xf32>
    %53 = vector.broadcast %52 : vector<1x128xf32> to vector<16x128xf32>
    %54 = arith.addf %51, %53 : vector<16x128xf32>
    %55 = vector.broadcast %6 : vector<1x128xf32> to vector<16x128xf32>
    %56 = arith.mulf %55, %54 : vector<16x128xf32>
    %57 = arith.addf %15, %56 : vector<16x128xf32>
    %c0_28 = arith.constant 0 : index
    %c0_29 = arith.constant 0 : index
    %58 = vector.load %arg14[%c0_28, %c0_29] : memref<1x128xf32, #tpu.memory_space<vmem>>, vector<1x128xf32>
    %c0_30 = arith.constant 0 : index
    %c0_31 = arith.constant 0 : index
    %59 = vector.load %arg15[%c0_30, %c0_31] : memref<1x128xf32, #tpu.memory_space<vmem>>, vector<1x128xf32>
    %cst_32 = arith.constant dense<0.000000e+00> : vector<16xf32>
    %60 = vector.multi_reduction <add>, %57, %cst_32 [1] : vector<16x128xf32> to vector<16xf32>
    %61 = vector.shape_cast %60 : vector<16xf32> to vector<16x1xf32>
    %cst_33 = arith.constant 1.280000e+02 : f32
    %62 = vector.broadcast %cst_33 : f32 to vector<16x1xf32>
    %63 = arith.divf %61, %62 : vector<16x1xf32>
    %64 = vector.broadcast %63 : vector<16x1xf32> to vector<16x128xf32>
    %65 = arith.subf %57, %64 : vector<16x128xf32>
    %66 = arith.mulf %65, %65 : vector<16x128xf32>
    %cst_34 = arith.constant dense<0.000000e+00> : vector<16xf32>
    %67 = vector.multi_reduction <add>, %66, %cst_34 [1] : vector<16x128xf32> to vector<16xf32>
    %68 = vector.shape_cast %67 : vector<16xf32> to vector<16x1xf32>
    %cst_35 = arith.constant 1.280000e+02 : f32
    %69 = vector.broadcast %cst_35 : f32 to vector<16x1xf32>
    %70 = arith.divf %68, %69 : vector<16x1xf32>
    %cst_36 = arith.constant 9.99999974E-6 : f32
    %71 = vector.broadcast %cst_36 : f32 to vector<16x1xf32>
    %72 = arith.addf %70, %71 : vector<16x1xf32>
    %73 = math.rsqrt %72 : vector<16x1xf32>
    %74 = vector.broadcast %73 : vector<16x1xf32> to vector<16x128xf32>
    %75 = arith.mulf %65, %74 : vector<16x128xf32>
    %76 = vector.broadcast %58 : vector<1x128xf32> to vector<16x128xf32>
    %77 = arith.mulf %75, %76 : vector<16x128xf32>
    %78 = vector.broadcast %59 : vector<1x128xf32> to vector<16x128xf32>
    %79 = arith.addf %77, %78 : vector<16x128xf32>
    %cst_37 = arith.constant 1.000000e+00 : f32
    %80 = vector.broadcast %cst_37 : f32 to vector<1x128xf32>
    %81 = arith.addf %80, %8 : vector<1x128xf32>
    %82 = vector.broadcast %81 : vector<1x128xf32> to vector<16x128xf32>
    %83 = arith.mulf %79, %82 : vector<16x128xf32>
    %84 = vector.broadcast %7 : vector<1x128xf32> to vector<16x128xf32>
    %85 = arith.addf %83, %84 : vector<16x128xf32>
    %86 = arith.truncf %85 : vector<16x128xf32> to vector<16x128xbf16>
    %c0_38 = arith.constant 0 : index
    %c0_39 = arith.constant 0 : index
    %87 = vector.load %arg16[%c0_38, %c0_39] : memref<128x512xbf16, #tpu.memory_space<vmem>>, vector<128x512xbf16>
    %cst_40 = arith.constant dense<0.000000e+00> : vector<16x512xf32>
    %88 = tpu.matmul %86, %87, %cst_40 {dimension_numbers = #tpu.dot_dimension_numbers<[1], [0], [0], [1], [0, 0, 1, 1], [], []>} : vector<16x128xbf16>, vector<128x512xbf16>, vector<16x512xf32> -> vector<16x512xf32>
    %c0_41 = arith.constant 0 : index
    %c0_42 = arith.constant 0 : index
    %89 = vector.load %arg17[%c0_41, %c0_42] : memref<1x512xf32, #tpu.memory_space<vmem>>, vector<1x512xf32>
    %90 = vector.broadcast %89 : vector<1x512xf32> to vector<16x512xf32>
    %91 = arith.addf %88, %90 : vector<16x512xf32>
    %cst_43 = arith.constant 5.000000e-01 : f32
    %92 = vector.broadcast %cst_43 : f32 to vector<16x512xf32>
    %93 = arith.mulf %92, %91 : vector<16x512xf32>
    %cst_44 = arith.constant 4.471500e-02 : f32
    %94 = vector.broadcast %cst_44 : f32 to vector<16x512xf32>
    %95 = arith.mulf %94, %91 : vector<16x512xf32>
    %96 = arith.mulf %95, %91 : vector<16x512xf32>
    %97 = arith.mulf %96, %91 : vector<16x512xf32>
    %98 = arith.addf %91, %97 : vector<16x512xf32>
    %cst_45 = arith.constant 0.797884583 : f32
    %99 = vector.broadcast %cst_45 : f32 to vector<16x512xf32>
    %100 = arith.mulf %99, %98 : vector<16x512xf32>
    %101 = math.tanh %100 : vector<16x512xf32>
    %cst_46 = arith.constant 1.000000e+00 : f32
    %102 = vector.broadcast %cst_46 : f32 to vector<16x512xf32>
    %103 = arith.addf %102, %101 : vector<16x512xf32>
    %104 = arith.mulf %93, %103 : vector<16x512xf32>
    %105 = arith.truncf %104 : vector<16x512xf32> to vector<16x512xbf16>
    %c0_47 = arith.constant 0 : index
    %c0_48 = arith.constant 0 : index
    %106 = vector.load %arg18[%c0_47, %c0_48] : memref<512x128xbf16, #tpu.memory_space<vmem>>, vector<512x128xbf16>
    %cst_49 = arith.constant dense<0.000000e+00> : vector<16x128xf32>
    %107 = tpu.matmul %105, %106, %cst_49 {dimension_numbers = #tpu.dot_dimension_numbers<[1], [0], [0], [1], [0, 0, 1, 1], [], []>} : vector<16x512xbf16>, vector<512x128xbf16>, vector<16x128xf32> -> vector<16x128xf32>
    %c0_50 = arith.constant 0 : index
    %c0_51 = arith.constant 0 : index
    %108 = vector.load %arg19[%c0_50, %c0_51] : memref<1x128xf32, #tpu.memory_space<vmem>>, vector<1x128xf32>
    %109 = vector.broadcast %108 : vector<1x128xf32> to vector<16x128xf32>
    %110 = arith.addf %107, %109 : vector<16x128xf32>
    %111 = vector.broadcast %9 : vector<1x128xf32> to vector<16x128xf32>
    %112 = arith.mulf %111, %110 : vector<16x128xf32>
    %113 = arith.addf %57, %112 : vector<16x128xf32>
    %c0_52 = arith.constant 0 : index
    %c0_53 = arith.constant 0 : index
    %c0_54 = arith.constant 0 : index
    %114 = vector.load %arg20[%c0_52, %c0_53, %c0_54] : memref<1x16x128xf32, #tpu.memory_space<vmem>>, vector<1x16x128xf32>
    %115 = vector.shape_cast %114 : vector<1x16x128xf32> to vector<16x128xf32>
    %116 = vector.shape_cast %113 : vector<16x128xf32> to vector<1x16x128xf32>
    tpu.vector_store %arg20[%c0_52, %c0_53, %c0_54], %116 {strides = array<i32>} : memref<1x16x128xf32, #tpu.memory_space<vmem>>, vector<1x16x128xf32>,
    return
  }
  func.func @transform_0(%arg0: i32, %arg1: i32) -> (i32, i32, i32) {
    %c0_i32 = arith.constant 0 : i32
    %c0_i32_0 = arith.constant 0 : i32
    %c0_i32_1 = arith.constant 0 : i32
    return %arg0, %c0_i32, %c0_i32_0 : i32, i32, i32
  }
  func.func @transform_1(%arg0: i32, %arg1: i32) -> (i32, i32, i32) {
    %c0_i32 = arith.constant 0 : i32
    %c0_i32_0 = arith.constant 0 : i32
    %c0_i32_1 = arith.constant 0 : i32
    return %arg0, %c0_i32, %c0_i32_0 : i32, i32, i32
  }
  func.func @transform_2(%arg0: i32, %arg1: i32) -> (i32, i32) {
    %c0_i32 = arith.constant 0 : i32
    %c0_i32_0 = arith.constant 0 : i32
    %c0_i32_1 = arith.constant 0 : i32
    return %c0_i32, %c0_i32_0 : i32, i32
  }
  func.func @transform_3(%arg0: i32, %arg1: i32) -> (i32, i32) {
    %c0_i32 = arith.constant 0 : i32
    %c0_i32_0 = arith.constant 0 : i32
    %c0_i32_1 = arith.constant 0 : i32
    return %c0_i32, %c0_i32_0 : i32, i32
  }
  func.func @transform_4(%arg0: i32, %arg1: i32) -> (i32, i32) {
    %c0_i32 = arith.constant 0 : i32
    %c0_i32_0 = arith.constant 0 : i32
    %c0_i32_1 = arith.constant 0 : i32
    return %c0_i32, %c0_i32_0 : i32, i32
  }
  func.func @transform_5(%arg0: i32, %arg1: i32) -> (i32, i32) {
    %c0_i32 = arith.constant 0 : i32
    %c0_i32_0 = arith.constant 0 : i32
    %c0_i32_1 = arith.constant 0 : i32
    return %c0_i32, %c0_i32_0 : i32, i32
  }
  func.func @transform_6(%arg0: i32, %arg1: i32) -> (i32, i32) {
    %c0_i32 = arith.constant 0 : i32
    %c0_i32_0 = arith.constant 0 : i32
    %c0_i32_1 = arith.constant 0 : i32
    return %c0_i32, %c0_i32_0 : i32, i32
  }
  func.func @transform_7(%arg0: i32, %arg1: i32) -> (i32, i32) {
    %c0_i32 = arith.constant 0 : i32
    %c0_i32_0 = arith.constant 0 : i32
    %c0_i32_1 = arith.constant 0 : i32
    return %c0_i32, %c0_i32_0 : i32, i32
  }
  func.func @transform_8(%arg0: i32, %arg1: i32) -> (i32, i32) {
    %c0_i32 = arith.constant 0 : i32
    %c0_i32_0 = arith.constant 0 : i32
    %c0_i32_1 = arith.constant 0 : i32
    return %c0_i32, %c0_i32_0 : i32, i32
  }
  func.func @transform_9(%arg0: i32, %arg1: i32) -> (i32, i32) {
    %c0_i32 = arith.constant 0 : i32
    %c0_i32_0 = arith.constant 0 : i32
    %c0_i32_1 = arith.constant 0 : i32
    return %c0_i32, %c0_i32_0 : i32, i32
  }
  func.func @transform_10(%arg0: i32, %arg1: i32) -> (i32, i32) {
    %c0_i32 = arith.constant 0 : i32
    %c0_i32_0 = arith.constant 0 : i32
    %c0_i32_1 = arith.constant 0 : i32
    return %c0_i32, %c0_i32_0 : i32, i32
  }
  func.func @transform_11(%arg0: i32, %arg1: i32) -> (i32, i32) {
    %c0_i32 = arith.constant 0 : i32
    %c0_i32_0 = arith.constant 0 : i32
    %c0_i32_1 = arith.constant 0 : i32
    return %c0_i32, %c0_i32_0 : i32, i32
  }
  func.func @transform_12(%arg0: i32, %arg1: i32) -> (i32, i32) {
    %c0_i32 = arith.constant 0 : i32
    %c0_i32_0 = arith.constant 0 : i32
    %c0_i32_1 = arith.constant 0 : i32
    return %c0_i32, %c0_i32_0 : i32, i32
  }
  func.func @transform_13(%arg0: i32, %arg1: i32) -> (i32, i32) {
    %c0_i32 = arith.constant 0 : i32
    %c0_i32_0 = arith.constant 0 : i32
    %c0_i32_1 = arith.constant 0 : i32
    return %c0_i32, %c0_i32_0 : i32, i32
  }
  func.func @transform_14(%arg0: i32, %arg1: i32) -> (i32, i32) {
    %c0_i32 = arith.constant 0 : i32
    %c0_i32_0 = arith.constant 0 : i32
    %c0_i32_1 = arith.constant 0 : i32
    return %c0_i32, %c0_i32_0 : i32, i32
  }
  func.func @transform_15(%arg0: i32, %arg1: i32) -> (i32, i32) {
    %c0_i32 = arith.constant 0 : i32
    %c0_i32_0 = arith.constant 0 : i32
    %c0_i32_1 = arith.constant 0 : i32
    return %c0_i32, %c0_i32_0 : i32, i32
  }
  func.func @transform_16(%arg0: i32, %arg1: i32) -> (i32, i32) {
    %c0_i32 = arith.constant 0 : i32
    %c0_i32_0 = arith.constant 0 : i32
    %c0_i32_1 = arith.constant 0 : i32
    return %c0_i32, %c0_i32_0 : i32, i32
  }
  func.func @transform_17(%arg0: i32, %arg1: i32) -> (i32, i32) {
    %c0_i32 = arith.constant 0 : i32
    %c0_i32_0 = arith.constant 0 : i32
    %c0_i32_1 = arith.constant 0 : i32
    return %c0_i32, %c0_i32_0 : i32, i32
  }
  func.func @transform_18(%arg0: i32, %arg1: i32) -> (i32, i32, i32) {
    %c0_i32 = arith.constant 0 : i32
    %c0_i32_0 = arith.constant 0 : i32
    return %arg0, %arg1, %c0_i32 : i32, i32, i32
  }
}

</mosaic_0001>

<bundles_post_ra>
// kernel: tpu_custom_call.1
= control target key start
LH: loop header
LB: loop body
LE: loop exit
PB: predicated region body
PF: predicated region fallthrough
CT: control target
= control target key end

     0   :  { %s4590_s0 = inlined_call_operand.hbm [shape: f32[2,16,128], index: 0, kind: input, shape index: {}]   ;;  %s4591_s1 = inlined_call_operand.vmem [shape: f32[2,6,128], index: 1, kind: input, shape index: {}]   ;;  %s4592_s2 = inlined_call_operand.vmem [shape: f32[1,128], index: 2, kind: input, shape index: {}]   ;;  %s4593_s3 = inlined_call_operand.vmem [shape: f32[1,128], index: 3, kind: input, shape index: {}]   ;;  %s4594_s4 = inlined_call_operand.hbm [shape: bf16[128,128], index: 4, kind: input, shape index: {}]   ;;  %s4595_s5 = inlined_call_operand.vmem [shape: f32[1,128], index: 5, kind: input, shape index: {}]   ;;  %s4596_s6 = inlined_call_operand.hbm [shape: bf16[128,128], index: 6, kind: input, shape index: {}]   ;;  %s4597_s7 = inlined_call_operand.vmem [shape: f32[1,128], index: 7, kind: input, shape index: {}]   ;;  %s4598_s8 = inlined_call_operand.hbm [shape: bf16[128,128], index: 8, kind: input, shape index: {}]   ;;  %s4599_s9 = inlined_call_operand.vmem [shape: f32[1,128], index: 9, kind: input, shape index: {}]   ;;  %s4600_s10 = inlined_call_operand.hbm [shape: bf16[128,128], index: 10, kind: input, shape index: {}]   ;;  %s4601_s11 = inlined_call_operand.vmem [shape: f32[1,128], index: 11, kind: input, shape index: {}]   ;;  %s4602_s12 = inlined_call_operand.vmem [shape: f32[1,128], index: 12, kind: input, shape index: {}]   ;;  %s4603_s13 = inlined_call_operand.vmem [shape: f32[1,128], index: 13, kind: input, shape index: {}]   ;;  %s4604_s14 = inlined_call_operand.hbm [shape: bf16[128,512], index: 14, kind: input, shape index: {}]   ;;  %s4605_s15 = inlined_call_operand.vmem [shape: f32[1,512], index: 15, kind: input, shape index: {}]   ;;  %s4606_s16 = inlined_call_operand.hbm [shape: bf16[512,128], index: 16, kind: input, shape index: {}]   ;;  %s4607_s17 = inlined_call_operand.vmem [shape: f32[1,128], index: 17, kind: input, shape index: {}]   ;;  %s4608_s18 = inlined_call_operand.hbm [shape: f32[2,16,128], index: 18, kind: output, shape index: {}]  }
   0x1   :  { %4617 = sst [smem:[#allocation26_spill]] %s4590_s0 }
   0x2   :  { %4618 = sst [smem:[#allocation27_spill]] %s4591_s1 }
   0x3   :  { %4619 = sst [smem:[#allocation28_spill]] %s4592_s2 }
   0x4   :  { %4620 = sst [smem:[#allocation29_spill]] %s4594_s4 }
   0x5   :  { %4621 = sst [smem:[#allocation30_spill]] %s4596_s6 }
   0x6   :  { %4622 = sst [smem:[#allocation31_spill]] %s4598_s8 }
   0x7   :  { %4623 = sst [smem:[#allocation32_spill]] %s4600_s10 }
   0x8   :  { %4624 = sst [smem:[#allocation33_spill]] %s4602_s12 }
   0x9   :  { %4625 = sst [smem:[#allocation34_spill]] %s4603_s13 }
   0xa   :  { %4626 = sst [smem:[#allocation35_spill]] %s4604_s14 }
   0xb   :  { %4627 = sst [smem:[#allocation36_spill]] %s4605_s15 }
   0xc   :  { %4628 = sst [smem:[#allocation37_spill]] %s4606_s16 }
   0xd   :  { %4629 = sst [smem:[#allocation38_spill]] %s4607_s17 }
   0xe   :  { %4630 = sst [smem:[#allocation39_spill]] %s4608_s18 }
   0xf   :  { %23 = vsyncpa [#allocation7], 0 }
  0x10   :  { %25 = vsyncpa [#allocation7 + $0x1], 0 }
  0x11   :  { %26 = vsyncpa [#allocation10], 0 }
  0x12   :  { %27 = vsyncpa [#allocation13], 0 }
  0x13   :  { %28 = vsyncpa [#allocation16], 0 }
  0x14   :  { %29 = vsyncpa [#allocation8], 0 }
  0x15   :  { %31 = vsyncpa [#allocation8 + $0x1], 0  ;;  %s4045_s27 = smov 0   ;;  %s4047_s28 = smov 0  }
  0x16   :  { %s4049_s29 = smov 0   ;;  %s4051_s30 = smov 0  }
  0x17   :  { %s4053_s0 = smov 0   ;;  %s4055_s19 = smov 0  }
  0x18 LB: > { %4631 = sst [smem:[#allocation24_spill]] %s3922_s0  ;;  %s4609_s1 = sadd.s32 4294967295, %s3926_s19   ;;  %s3926_s19 = sphi %s4055_s19, %s37_s19   ;;  %s3922_s0 = sphi %s4053_s0, %s4662_s0   ;;  %s3918_s30 = sphi %s4051_s30, %s4661_s30   ;;  %s3914_s29 = sphi %s4049_s29, %s4665_s29   ;;  %s3910_s28 = sphi %s4047_s28, %s4664_s28   ;;  %s3906_s27 = sphi %s4045_s27, %s4663_s27  }
  0x19   : > { %p2925_p0 = scmp.ge.s32.totalorder %s3926_s19, 1  ;;  %p4079_p1 = scmp.eq.s32.totalorder %s4609_s1, 0 }
  0x1a   : > { %p470_p2 = scmp.lt.s32.totalorder %s3926_s19, 3  ;;  %s3928_s22 = smov [#allocation9]  }
  0x1b   : > { %s488_s2 = sshll.u32 %s3928_s22, 4  ;;  %s3929_s24 = smov [#allocation12]   ;;  %s489_s2 = int_to_ptr.vmem [resolvable:$true] %s488_s2 }
  0x1c   : > { %p4084_p3 = pnand %p2925_p0, %p470_p2  ;;  %s520_s25 = sshll.u32 %s3929_s24, 4  ;;  %s521_s25 = int_to_ptr.vmem [resolvable:$true] %s520_s25 }
  0x1d   : > { %s3930_s26 = smov [#allocation15]   ;;  %s3661_s22 = scalar_lea.vmem %s489_s2, 1024 }
  0x1e   : > { %p3359_p4 = pneg %p4084_p3  ;;  %s558_s1 = sshll.u32 %s3930_s26, 4  ;;  %s559_s1 = int_to_ptr.vmem [resolvable:$true] %s558_s1 }
  0x1f   : > { %p3662_p8 = scmp.ne.s32.totalorder %s489_s2, %s3661_s22  ;;  %p3669_p11 = scmp.lt.s32.totalorder %s489_s2, %s489_s2 }
  0x20   : > { %p4093_p6 = pnand %p3359_p4, %p4079_p1  ;;  %p3670_p12 = scmp.lt.s32.totalorder %s3661_s22, %s3661_s22 }
  0x22   : > { %p4099_p7 = pneg %p4093_p6  ;;  %p3671_p13 = por %p3670_p12, %p3669_p11 }
  0x24   : > { %p3664_p9 = pnand %p3662_p8, %p4099_p7 }
  0x26   : > { %p3665_p10 = pneg %p3664_p9 }
  0x28   : > { %p3672_p0 = pnand %p3671_p13, %p3665_p10 }
  0x2a   : > { %3675 = shalt.err (!%p3672_p0)
}
  0x2b   : > { %s4611_s24 = smov 64   ;;  %s4613_s26 = smov 4  }
  0x2c   : > { %s4636_s4 = sld [smem:[#allocation29_spill]]  ;;  %s3687_s13 = scalar_lea.vmem %s521_s25, 1024 }
  0x2d   : > { %p3688_p2 = scmp.ne.s32.totalorder %s521_s25, %s3687_s13  ;;  %p3695_p9 = scmp.lt.s32.totalorder %s521_s25, %s521_s25 }
  0x2e   : > { %p3696_p10 = scmp.lt.s32.totalorder %s3687_s13, %s3687_s13 }
  0x2f   : > { %p3690_p4 = pnand %p3688_p2, %p4099_p7 }
  0x30   : > { %p3697_p11 = por %p3696_p10, %p3695_p9 }
  0x31   : > { %p3691_p8 = pneg %p3690_p4 }
  0x32   : > { %3362 = dma.hbm_to_vmem [thread:$0]  (!%p4093_p6), %s4636_s4, 1024, %s489_s2, [#allocation10], %s4611_s24, %s4611_s24, %s4613_s26  }
  0x33   : > { %p3698_p12 = pnand %p3697_p11, %p3691_p8 }
  0x35   : > { %3701 = shalt.err (!%p3698_p12)
}
  0x36   : > { %s4637_s8 = sld [smem:[#allocation31_spill]]  ;;  %s3713_s15 = scalar_lea.vmem %s559_s1, 4096 }
  0x37   : > { %p3714_p13 = scmp.ne.s32.totalorder %s559_s1, %s3713_s15  ;;  %p3721_p4 = scmp.lt.s32.totalorder %s559_s1, %s559_s1 }
  0x38   : > { %p3722_p9 = scmp.lt.s32.totalorder %s3713_s15, %s3713_s15 }
  0x39   : > { %p3716_p0 = pnand %p3714_p13, %p4099_p7 }
  0x3a   : > { %p3723_p8 = por %p3722_p9, %p3721_p4 }
  0x3b   : > { %p3717_p2 = pneg %p3716_p0 }
  0x3c   : > { %3368 = dma.hbm_to_vmem [thread:$0]  (!%p4093_p6), %s4637_s8, 1024, %s521_s25, [#allocation13], %s4611_s24, %s4611_s24, %s4613_s26  }
  0x3d   : > { %p3724_p10 = pnand %p3723_p8, %p3717_p2 }
  0x3f   : > { %3727 = shalt.err (!%p3724_p10)
}
  0x40   : > { %s3933_s13 = smov 256   ;;  %s3934_s17 = smov 16  }
  0x41   : > { %s4638_s14 = sld [smem:[#allocation35_spill]]  ;;  %s3935_s25 = smov [#allocation11]  }
  0x42   : > { %s504_s22 = sshll.u32 %s3935_s25, 4  ;;  %s3936_s24 = smov [#allocation14]   ;;  %s505_s22 = int_to_ptr.vmem [resolvable:$true] %s504_s22 }
  0x43   : > { %s536_s26 = sshll.u32 %s3936_s24, 4  ;;  %s3739_s4 = scalar_lea.vmem %s505_s22, 1024  ;;  %s537_s26 = int_to_ptr.vmem [resolvable:$true] %s536_s26 }
  0x44   : > { %p3740_p11 = scmp.ne.s32.totalorder %s505_s22, %s3739_s4  ;;  %p3747_p0 = scmp.lt.s32.totalorder %s505_s22, %s505_s22 }
  0x45   : > { %p3748_p2 = scmp.lt.s32.totalorder %s3739_s4, %s3739_s4 }
  0x46   : > { %p3742_p12 = pnand %p3740_p11, %p4099_p7 }
  0x47   : > { %3374 = dma.hbm_to_vmem [thread:$0]  (!%p4093_p6), %s4638_s14, 4096, %s559_s1, [#allocation16], %s3933_s13, %s3933_s13, %s3934_s17  }
  0x48   : > { %p3743_p13 = pneg %p3742_p12  ;;  %p3749_p4 = por %p3748_p2, %p3747_p0 }
  0x4a   : > { %p3750_p9 = pnand %p3749_p4, %p3743_p13 }
  0x4c   : > { %3753 = shalt.err (!%p3750_p9)
}
  0x4d   : > { %s4639_s15 = smov 4   ;;  %s4640_s2 = smov 64  }
  0x4e   : > { %s4641_s6 = sld [smem:[#allocation30_spill]]  ;;  %s3765_s24 = scalar_lea.vmem %s537_s26, 1024 }
  0x4f   : > { %p3766_p8 = scmp.ne.s32.totalorder %s537_s26, %s3765_s24  ;;  %p3773_p12 = scmp.lt.s32.totalorder %s537_s26, %s537_s26 }
  0x50   : > { %p3774_p0 = scmp.lt.s32.totalorder %s3765_s24, %s3765_s24 }
  0x51   : > { %p3768_p10 = pnand %p3766_p8, %p4099_p7 }
  0x52   : > { %p3775_p13 = por %p3774_p0, %p3773_p12 }
  0x53   : > { %p3769_p11 = pneg %p3768_p10 }
  0x54   : > { %3365 = dma.hbm_to_vmem [thread:$0]  (!%p4093_p6), %s4641_s6, 1024, %s505_s22, [#allocation10], %s4640_s2, %s4640_s2, %s4639_s15  }
  0x55   : > { %p3776_p2 = pnand %p3775_p13, %p3769_p11 }
  0x57   : > { %3779 = shalt.err (!%p3776_p2)
}
  0x58   : > { %s4642_s10 = sld [smem:[#allocation32_spill]]  ;;  %s3937_s12 = smov [#allocation17]  }
  0x59   : > { %s574_s25 = sshll.u32 %s3937_s12, 4  ;;  %s575_s25 = int_to_ptr.vmem [resolvable:$true] %s574_s25 }
  0x5a   : > { %s3791_s22 = scalar_lea.vmem %s575_s25, 4096  ;;  %p3799_p10 = scmp.lt.s32.totalorder %s575_s25, %s575_s25 }
  0x5b   : > { %p3792_p4 = scmp.ne.s32.totalorder %s575_s25, %s3791_s22  ;;  %p3800_p11 = scmp.lt.s32.totalorder %s3791_s22, %s3791_s22 }
  0x5d   : > { %p3794_p9 = pnand %p3792_p4, %p4099_p7  ;;  %p3801_p12 = por %p3800_p11, %p3799_p10 }
  0x5e   : > { %3371 = dma.hbm_to_vmem [thread:$0]  (!%p4093_p6), %s4642_s10, 1024, %s537_s26, [#allocation13], %s4640_s2, %s4640_s2, %s4639_s15  }
  0x5f   : > { %p3795_p8 = pneg %p3794_p9 }
  0x61   : > { %p3802_p0 = pnand %p3801_p12, %p3795_p8 }
  0x63   : > { %3805 = shalt.err (!%p3802_p0)
}
  0x64   : > { %s4643_s16 = sld [smem:[#allocation37_spill]]  ;;  %s2924_s18 = sadd.s32 4294967294, %s3926_s19  }
  0x65   : > { %s49_s23 = sadd.s32 1, %s3922_s0  ;;  %s56_s13 = sadd.s32 1, %s3914_s29 }
  0x66   : > { %p51_p7 = scmp.ge.s32.totalorder %s49_s23, 2  ;;  %p63_p13 = scmp.ne.s32.totalorder %s3914_s29, %s3910_s28 }
  0x67   : > { %p64_p2 = scmp.eq.s32.totalorder %s3926_s19, 0  ;;  %p69_p9 = scmp.ne.s32.totalorder %s3910_s28, %s3906_s27 }
  0x68   : > { %s4667_s23 = smov (%p51_p7, %s49_s23), 0  ;;  %p463_p12 = scmp.eq.s32.totalorder %s2924_s18, 1 }
  0x69   : > { %4644 = sst [smem:[#allocation25_spill]] %s4667_s23  ;;  %p4168_p4 = por %p64_p2, %p63_p13 }
  0x6a   : > { %3377 = dma.hbm_to_vmem [thread:$0]  (!%p4093_p6), %s4643_s16, 4096, %s575_s25, [#allocation16], %s4640_s2, %s4640_s2, %s4639_s15  }
  0x6b   : > { %s53_s15 = ssub.s32 %s3922_s0, %s4667_s23  ;;  %s4646_s2 = sadd.s32 4294967295, %s3926_s19  }
  0x6c   : > { %p457_p6 = scmp.eq.s32.totalorder %s4646_s2, 1  ;;  %p54_p8 = scmp.eq.s32.totalorder %s53_s15, 0 }
  0x6d   : > { %p4180_p10 = por %p4079_p1, %p69_p9  ;;  %p4191_p0 = por %p463_p12, %p69_p9 }
  0x6e   : > { %p4184_p11 = por %p457_p6, %p63_p13  ;;  %p3392_p7 = scmp.lt.s32.totalorder %s3926_s19, 2 }
  0x6f   : > { %s4189_s12 = scalar_select %p54_p8, %s3914_s29, %s56_s13  }
  0x70   : > { %s4649_s25 = scalar_select %p4191_p0, 1, 0 }
  0x71   : > { %s591_s22 = sand.u32 1, %s3914_s29   ;;  %s3091_s1 = sshll.u32 %s3922_s0, 8 }
  0x72   : > { %s2933_s26 = sshll.u32 %s591_s22, 4  ;;  %s4650_s6 = sld [smem:[#allocation26_spill]] }
  0x73   : > { %s595_s10 = scalar_lea.vmem [#allocation6], %s2933_s26  ;;  %p4203_p13 = pnand %p3392_p7, %p4168_p4 }
  0x74   : > { %s602_s14 = sshll.u32 %s595_s10, 4  ;;  %s592_s18 = scalar_lea.sflag [#allocation7], %s591_s22  ;;  %s603_s14 = int_to_ptr.vmem [resolvable:$true] %s602_s14 }
  0x75   : > { %p3808_p2 = pneg %p4203_p13  ;;  %s3819_s13 = scalar_lea.vmem %s603_s14, 256 }
  0x76   : > { %p3820_p9 = scmp.ne.s32.totalorder %s603_s14, %s3819_s13  ;;  %s3938_s23 = smov [#allocation6]  }
  0x77   : > { %s3824_s0 = sshll.u32 %s3938_s23, 4  ;;  %s3825_s0 = int_to_ptr.vmem [resolvable:$false] %s3824_s0 }
  0x78   : > { %s601_s8 = scalar_lea.hbm %s4650_s6, %s3091_s1  ;;  %p3822_p6 = pnand %p3820_p9, %p3808_p2 }
  0x79   : > { %s3826_s6 = scalar_lea.vmem %s3825_s0, 512  ;;  %p3827_p12 = scmp.lt.s32.totalorder %s603_s14, %s3825_s0 }
  0x7a   : > { %p3823_p8 = pneg %p3822_p6  ;;  %p3828_p5 = scmp.lt.s32.totalorder %s3826_s6, %s3819_s13 }
  0x7c   : > { %p3829_p0 = por %p3828_p5, %p3827_p12 }
  0x7e   : > { %p3830_p4 = pnand %p3829_p0, %p3823_p8 }
  0x80   : > { %3833 = shalt.err (!%p3830_p4)
}
  0x81   : > { %s3939_s10 = smov 128   ;;  %s3940_s24 = smov 8  }
  0x82   : > { %3381 = dma.hbm_to_vmem [thread:$0]  (!%p4203_p13), %s601_s8, 256, %s603_s14, %s592_s18, %s3939_s10, %s3939_s10, %s3940_s24  }
  0x83   : > { %621 = sbr.rel (%p4084_p3) target bundleno = 2614 (0xa36), region = 92  ;;  %s4214_s22 = sand.u32 (!%p4084_p3), 1, %s3910_s28  }
  0x84   : > { %s2937_s0 = sshll.u32 (!%p4084_p3), %s4214_s22, 4  ;;  %s624_s23 = scalar_lea.sflag (!%p4084_p3), [#allocation7], %s4214_s22 }
  0x85   : > { %s4220_s1 = scalar_lea.vmem (!%p4084_p3), [#allocation6], %s2937_s0 }
  0x88   : > { %3885 = dma.done.wait (%p4180_p10), %s624_s23, 256  }
  0x89   : > { %3887 = vsyncadd (%p4180_p10), %s624_s23, 4294967040 }
  0x8a   : > { %3889 = dma.done.wait (%p4079_p1), [#allocation10], 2048  }
  0x8b   : > { %3891 = vsyncadd (%p4079_p1), [#allocation10], 4294965248 }
  0x8c   : > { %3893 = dma.done.wait (%p4079_p1), [#allocation13], 2048  }
  0x8d   : > { %3895 = vsyncadd (%p4079_p1), [#allocation13], 4294965248 }
  0x8e   : > { %3897 = dma.done.wait (%p4079_p1), [#allocation16], 8192  }
  0x8f   : > { %3899 = vsyncadd (%p4079_p1), [#allocation16], 4294959104  ;;  %v720_v0 = vld [vmem:[%s4220_s1] sm:$0xff]  ;;  %v721_v1 = vld [vmem:[%s4220_s1 + $0x8] sm:$0xff]  ;;  %v3941_v11 = vmov 0.0   ;;  %vm3942_vm0 = vmmov 0   ;;  %v764_v33 = vlaneseq }
  0x90   : > { %724 = vadd.xlane.f32.xlu0 %v720_v0  ;;  %v3468_v10 = vld [vmem:[#allocation9 + $0x38] sm:$0xff]   ;;  %3203 = vmatprep.subr.bf16.mxu0 %v3941_v11  ;;  %v3470_v13 = vld [vmem:[#allocation9 + $0x30] sm:$0xff]   ;;  %v3472_v15 = vld [vmem:[#allocation9 + $0x28] sm:$0xff]   ;;  %p708_p1 = scmp.lt.s32.totalorder %s3918_s30, 1  ;;  %s4652_s21 = sld [smem:[#allocation27_spill]]  ;;  %vm1123_vm1 = vcmask 257024  }
  0x91   : > { %3223 = vmatprep.subr.bf16.mxu1 %v3941_v11  ;;  %v3469_v12 = vld [vmem:[#allocation11 + $0x38] sm:$0xff]   ;;  %3204 = vmatpush3.bf16.msra.mxu0 %v3468_v10  ;;  %v3471_v14 = vld [vmem:[#allocation11 + $0x30] sm:$0xff]   ;;  %v3473_v16 = vld [vmem:[#allocation11 + $0x28] sm:$0xff]   ;;  %v4277_v34 = vshrl.u32 %v764_v33, 7  ;;  %s4653_s2 = sld [smem:[#allocation28_spill]]  ;;  %vm1260_vm2 = vcmask 261120  }
  0x92   : > { %3224 = vmatpush3.bf16.msra.mxu1 %v3469_v12  ;;  %3205 = vmatprep.subr.bf16.mxu0 %v3941_v11  ;;  %v3474_v17 = vld [vmem:[#allocation9 + $0x20] sm:$0xff]   ;;  %v3476_v19 = vld [vmem:[#allocation9 + $0x18] sm:$0xff]   ;;  %v3478_v21 = vld [vmem:[#allocation9 + $0x10] sm:$0xff]   ;;  %s709_s8 = scalar_select %p708_p1, %s3918_s30, 1  ;;  %vm1479_vm3 = vcmask 130048   ;;  %vm1803_vm4 = vcmask 519424  }
  0x93   : > { %3225 = vmatprep.subr.bf16.mxu1 %v3941_v11  ;;  %3219 = vmatprep.mubr.msk.bf16.mxu0 %vm3942_vm0, %v3941_v11  ;;  %v3475_v18 = vld [vmem:[#allocation11 + $0x20] sm:$0xff]   ;;  %v3477_v20 = vld [vmem:[#allocation11 + $0x18] sm:$0xff]   ;;  %v3479_v22 = vld [vmem:[#allocation11 + $0x10] sm:$0xff]   ;;  %v766_v40 = vsub.s32 1, %v4277_v34  ;;  %v772_v47 = vsub.s32 0, %v4277_v34  ;;  %s3945_s16 = smov 32  }
  0x94   : > { %726 = vadd.xlane.f32.xlu0 %v721_v1  ;;  %3239 = vmatprep.mubr.msk.bf16.mxu1 %vm3942_vm0, %v3941_v11  ;;  %v3480_v23 = vld [vmem:[#allocation9 + $0x8] sm:$0xff]   ;;  %v3482_v25 = vld [vmem:[#allocation9] sm:$0xff]   ;;  %s2945_s14 = sshll.u32 %s709_s8, 3  ;;  %v2947_v41 = vld [vmem:[%s4593_s3] ss:$0 sm:$0xff]  ;;  %s3943_s8 = smov 96  }
  0x95   : > { %3206 = vmatpush3.bf16.msra.mxu0 %v3470_v13  ;;  %v3481_v24 = vld [vmem:[#allocation11 + $0x8] sm:$0xff]   ;;  %v3483_v26 = vld [vmem:[#allocation11] sm:$0xff]   ;;  %v3484_v55 = vld [vmem:[#allocation12 + $0x38] sm:$0xff]   ;;  %vm1818_vm5 = vcmask 781824   ;;  %vm1833_vm6 = vcmask 1044224   ;;  %s4654_s18 = sld [smem:[#allocation33_spill]] }
  0x96   : > { %3226 = vmatpush3.bf16.msra.mxu1 %v3471_v14  ;;  %3207 = vmatprep.subr.bf16.mxu0 %v3941_v11  ;;  %s4275_s4 = scalar_lea.vmem %s4652_s21, %s2945_s14  ;;  %v3485_v57 = vld [vmem:[#allocation12 + $0x30] sm:$0xff]   ;;  %v3486_v58 = vld [vmem:[#allocation12 + $0x28] sm:$0xff]   ;;  %v3487_v59 = vld [vmem:[#allocation12 + $0x20] sm:$0xff]   ;;  %s3944_s14 = smov 64  }
  0x97   : > { %3227 = vmatprep.subr.bf16.mxu1 %v3941_v11  ;;  %v4280_v35 = vld [vmem:[%s4275_s4] sm:$0x3f]  ;;  %v3489_v61 = vld [vmem:[#allocation12 + $0x10] sm:$0xff]   ;;  %v3490_v62 = vld [vmem:[#allocation12 + $0x8] sm:$0xff]   ;;  %s4655_s10 = sld [smem:[#allocation34_spill]]  ;;  %s707_s20 = scalar_lea.vmem [#allocation18], %s2937_s0 }
  0x98   : > { %v2946_v37 = vld [vmem:[%s4653_s2] ss:$0 sm:$0xff]  ;;  %v4287_v39 = vadd.f32 1.0, %v4280_v35  ;;  %v773_v51 = vrot.slane %v4280_v35, %v772_v47  ;;  %v3491_v63 = vld [vmem:[#allocation12] sm:$0xff]   ;;  %s4656_s23 = sld [smem:[#allocation36_spill]]  ;;  %s2766_s21 = sshll.u32 %s707_s20, 4  ;;  %s4541_s21 = int_to_ptr.vmem [resolvable:$true] %s2766_s21 }
  0x99   : > { %3208 = vmatpush3.bf16.msra.mxu0 %v3472_v15  ;;  %v3488_v60 = vld [vmem:[#allocation12 + $0x18] sm:$0xff]   ;;  %s3106_s26 = sshll.u32 %s3918_s30, 8  ;;  %s4658_s2 = sld [smem:[#allocation39_spill]] }
  0x9a   : > { %3228 = vmatpush3.bf16.msra.mxu1 %v3473_v16  ;;  %3209 = vmatprep.subr.bf16.mxu0 %v3941_v11  ;;  %v767_v46 = vrot.slane %v4287_v39, %v766_v40  ;;  %s2751_s13 = scalar_lea.sflag [#allocation8], %s4214_s22  ;;  %s3834_s0 = scalar_lea.vmem %s4541_s21, 256 }
  0x9b   : > { %3229 = vmatprep.subr.bf16.mxu1 %v3941_v11  ;;  %p3835_p3 = scmp.ne.s32.totalorder %s4541_s21, %s3834_s0  ;;  %s3947_s30 = smov [#allocation18]  }
  0x9c   : > { %s3838_s6 = sshll.u32 %s3947_s30, 4  ;;  %s3839_s6 = int_to_ptr.vmem [resolvable:$false] %s3838_s6 }
  0x9d   : > { %3210 = vmatpush3.bf16.msra.mxu0 %v3474_v17  ;;  %p3836_p5 = pnand %p3835_p3, %p4184_p11  ;;  %p3841_p0 = scmp.lt.s32.totalorder %s4541_s21, %s3839_s6 }
  0x9e   : > { %3230 = vmatpush3.bf16.msra.mxu1 %v3475_v18  ;;  %3211 = vmatprep.subr.bf16.mxu0 %v3941_v11 }
  0x9f   : > { %3231 = vmatprep.subr.bf16.mxu1 %v3941_v11  ;;  %p3837_p10 = pneg %p3836_p5 }
  0xa1   : > { %3212 = vmatpush3.bf16.msra.mxu0 %v3476_v19 }
  0xa2   : > { %3232 = vmatpush3.bf16.msra.mxu1 %v3477_v20  ;;  %3213 = vmatprep.subr.bf16.mxu0 %v3941_v11 }
  0xa3   : > { %3233 = vmatprep.subr.bf16.mxu1 %v3941_v11 }
  0xa5   : > { %3214 = vmatpush3.bf16.msra.mxu0 %v3478_v21 }
  0xa6   : > { %3234 = vmatpush3.bf16.msra.mxu1 %v3479_v22  ;;  %3215 = vmatprep.subr.bf16.mxu0 %v3941_v11 }
  0xa7   : > { %3235 = vmatprep.subr.bf16.mxu1 %v3941_v11 }
  0xa9   : > { %3216 = vmatpush3.bf16.msra.mxu0 %v3480_v23 }
  0xaa   : > { %3236 = vmatpush3.bf16.msra.mxu1 %v3481_v24  ;;  %3217 = vmatprep.subr.bf16.mxu0 %v3941_v11  ;;  %v2966_v24 = vld [vmem:[%s4599_s9] ss:$0 sm:$0xff] }
  0xab   : > { %3237 = vmatprep.subr.bf16.mxu1 %v3941_v11 }
  0xad   : > { %3218 = vmatpush3.bf16.msra.mxu0 %v3482_v25 }
  0xae   : > { %3238 = vmatpush3.bf16.msra.mxu1 %v3483_v26  ;;  %3243 = vmatprep.subr.bf16.mxu0 %v3941_v11 }
  0xaf   : > { %3263 = vmatprep.subr.bf16.mxu1 %v3941_v11 }
 0x119   : > { %v725_v2 = vpop.xlane.xlu0 %724 }
 0x11a   : > { %v729_v3 = vmul.f32 0.0078125, %v725_v2 }
 0x11c   : > { %v4240_v4 = vsub.f32 %v720_v0, %v729_v3  ;;  %v2948_v0 = vld [vmem:[%s4595_s5] ss:$0 sm:$0xff] }
 0x11d   : > { %v727_v5 = vpop.xlane.xlu0 %726 }
 0x11e   : > { %v730_v6 = vmul.f32 0.0078125, %v727_v5  ;;  %v733_v7 = vmul.f32 %v4240_v4, %v4240_v4 }
 0x120   : > { %v4244_v8 = vsub.f32 %v721_v1, %v730_v6  ;;  %735 = vadd.xlane.f32.xlu1 %v733_v7  ;;  %v2957_v1 = vld [vmem:[%s4597_s7] ss:$0 sm:$0xff] }
 0x122   : > { %v734_v9 = vmul.f32 %v4244_v8, %v4244_v8 }
 0x124   : > { %737 = vadd.xlane.f32.xlu1 %v734_v9 }
 0x1a9   : > { %v736_v27 = vpop.xlane.xlu1 %735 }
 0x1aa   : > { %v739_v28 = vmul.f32 0.0078125, %v736_v27 }
 0x1ac   : > { %v741_v29 = vadd.f32 1e-05, %v739_v28 }
 0x1ad   : > { %v738_v30 = vpop.xlane.xlu1 %737 }
 0x1ae   : > { %3593 = vrsqrt.f32 %v741_v29  ;;  %v740_v31 = vmul.f32 0.0078125, %v738_v30 }
 0x1b0   : > { %v742_v32 = vadd.f32 1e-05, %v740_v31 }
 0x1b2   : > { %3595 = vrsqrt.f32 %v742_v32 }
 0x1bb   : > { %v3594_v36 = vpop.eup %3593 }
 0x1bc   : > { %v745_v38 = vmul.f32 %v3594_v36, %v4240_v4 }
 0x1be   : > { %v753_v42 = vmul.f32 %v2946_v37, %v745_v38 }
 0x1bf   : > { %v3596_v43 = vpop.eup %3595 }
 0x1c0   : > { %v746_v44 = vmul.f32 %v3596_v43, %v4244_v8  ;;  %v761_v45 = vadd.f32 %v2947_v41, %v753_v42 }
 0x1c2   : > { %v754_v48 = vmul.f32 %v2946_v37, %v746_v44  ;;  %v768_v50 = vmul.f32 %v767_v46, %v761_v45 }
 0x1c4   : > { %v762_v49 = vadd.f32 %v2947_v41, %v754_v48  ;;  %v774_v53 = vadd.f32 %v773_v51, %v768_v50 }
 0x1c6   : > { %v769_v52 = vmul.f32 %v767_v46, %v762_v49 }
 0x1c8   : > { %v775_v54 = vadd.f32 %v773_v51, %v769_v52 }
 0x1ca   : > { %v776_v56 = vpack.c.bf16 %v775_v54, %v774_v53 }
 0x1cc   : > { %3220 = vmatmul.mubr.bf16.vlgmr.msra.gmra.mxu0 %v776_v56  ;;  %3240 = vmatmul.mubr.bf16.vlgmr.msra.gmra.mxu1 %v776_v56 }
 0x1cd   : > { %3244 = vmatpush3.bf16.msra.mxu0 %v3484_v55  ;;  %3259 = vmatprep.mubr.msk.bf16.mxu0 %vm3942_vm0, %v3941_v11 }
 0x1ce   : > { %3245 = vmatprep.subr.bf16.mxu0 %v3941_v11  ;;  %3265 = vmatprep.mubr.msk.bf16.mxu1 %vm3942_vm0, %v3941_v11 }
 0x1d1   : > { %3246 = vmatpush3.bf16.msra.mxu0 %v3485_v57 }
 0x1d2   : > { %3247 = vmatprep.subr.bf16.mxu0 %v3941_v11 }
 0x1d5   : > { %3248 = vmatpush3.bf16.msra.mxu0 %v3486_v58 }
 0x1d6   : > { %3249 = vmatprep.subr.bf16.mxu0 %v3941_v11 }
 0x1d9   : > { %3250 = vmatpush3.bf16.msra.mxu0 %v3487_v59 }
 0x1da   : > { %3251 = vmatprep.subr.bf16.mxu0 %v3941_v11 }
 0x1dd   : > { %3252 = vmatpush3.bf16.msra.mxu0 %v3488_v60 }
 0x1de   : > { %3253 = vmatprep.subr.bf16.mxu0 %v3941_v11 }
 0x1e1   : > { %3254 = vmatpush3.bf16.msra.mxu0 %v3489_v61 }
 0x1e2   : > { %3255 = vmatprep.subr.bf16.mxu0 %v3941_v11 }
 0x1e5   : > { %3256 = vmatpush3.bf16.msra.mxu0 %v3490_v62 }
 0x1e6   : > { %3257 = vmatprep.subr.bf16.mxu0 %v3941_v11 }
 0x1e9   : > { %3258 = vmatpush3.bf16.msra.mxu0 %v3491_v63 }
 0x1ea   : > { %3311 = vmatprep.subr.bf16.mxu0 %v3941_v11 }
 0x1ec   : > { %3260 = vmatmul.mubr.bf16.vlgmr.msra.gmra.mxu0 %v776_v56 }
 0x1ed   : > { %3327 = vmatprep.mubr.msk.bf16.mxu0 %vm3942_vm0, %v3941_v11 }
 0x28c   : > { %v882_v2 = vpop.f32.mrf.mxu0  ;;  %v994_v3 = vpop.f32.mrf.mxu1 }
 0x28d   : > { %v883_v4 = vadd.f32 %v2948_v0, %v882_v2  ;;  %v995_v5 = vadd.f32 %v2957_v1, %v994_v3 }
 0x28e   : > { %v3221_v6 = vpop.f32.mrf.mxu0  ;;  %v3241_v7 = vpop.f32.mrf.mxu1 }
 0x28f   : > { %v1113_v8 = vmul.f32 0.17677669, %v883_v4  ;;  %v3094_v9 = vpack.c.bf16 %v995_v5, %v995_v5 }
 0x290   : > { %v885_v10 = vpop.f32.mrf.mxu0  ;;  %v997_v12 = vpop.f32.mrf.mxu1 }
 0x291   : > { %v3092_v13 = vpack.c.bf16 %v1113_v8, %v1113_v8  ;;  %1134 = vst.msk [vmem:[#allocation3] sm:$0xf] %vm1123_vm1, %v3094_v9  ;;  %v886_v14 = vadd.f32 %v2948_v0, %v885_v10  ;;  %v998_v15 = vadd.f32 %v2957_v1, %v997_v12  ;;  %1155 = vrot.lane.b32.xlu0 %v3094_v9, %s3943_s8 }
 0x292   : > { %v3222_v16 = vpop.f32.mrf.mxu0  ;;  %v3242_v17 = vpop.f32.mrf.mxu1 }
 0x293   : > { %1124 = vst.msk [vmem:[#allocation2] sm:$0xf] %vm1123_vm1, %v3092_v13  ;;  %v1114_v18 = vmul.f32 0.17677669, %v886_v14  ;;  %v3095_v19 = vpack.c.bf16 %v998_v15, %v998_v15  ;;  %1146 = vrot.lane.b32.xlu1 %v3092_v13, %s3943_s8 }
 0x295   : > { %v3093_v20 = vpack.c.bf16 %v1114_v18, %v1114_v18  ;;  %1135 = vst.msk [vmem:[#allocation3 + $0x4] sm:$0xf] %vm1123_vm1, %v3095_v19  ;;  %1182 = vrot.lane.b32.xlu0 %v3094_v9, %s3944_s14 }
 0x297   : > { %1125 = vst.msk [vmem:[#allocation2 + $0x4] sm:$0xf] %vm1123_vm1, %v3093_v20  ;;  %1157 = vrot.lane.b32.xlu1 %v3095_v19, %s3943_s8 }
 0x299   : > { %1173 = vrot.lane.b32.xlu0 %v3092_v13, %s3944_s14 }
 0x29b   : > { %1184 = vrot.lane.b32.xlu1 %v3095_v19, %s3944_s14 }
 0x29c   : > { %v3492_v21 = vld [vmem:[#allocation3] sm:$0xff]  }
 0x29d   : > { %1209 = vrot.lane.b32.xlu0 %v3094_v9, %s3945_s16  ;;  %v1265_v22 = vsel %vm1260_vm2, %v3492_v21, 0 }
 0x29e   : > { %3264 = vmatpush3.bf16.xpose.msra.mxu1 %v1265_v22  ;;  %v3493_v23 = vld [vmem:[#allocation2] sm:$0xff]  }
 0x29f   : > { %1148 = vrot.lane.b32.xlu1 %v3093_v20, %s3943_s8  ;;  %3269 = vmatprep.subr.bf16.mxu1 %v3941_v11 }
 0x2a1   : > { %1200 = vrot.lane.b32.xlu0 %v3092_v13, %s3945_s16 }
 0x2a3   : > { %1175 = vrot.lane.b32.xlu1 %v3093_v20, %s3944_s14 }
 0x2a5   : > { %3266 = vmatmul.mubr.msk.bf16.vlgmr.msra.gmra.mxu1 %vm1260_vm2, %v3493_v23 }
 0x2a6   : > { %3271 = vmatprep.mubr.msk.bf16.mxu1 %vm3942_vm0, %v3941_v11 }
 0x2a7   : > { %1211 = vrot.lane.b32.xlu1 %v3095_v19, %s3945_s16 }
 0x2ab   : > { %1202 = vrot.lane.b32.xlu1 %v3093_v20, %s3945_s16 }
 0x2ac   : > { %v1106_v25 = vpop.f32.mrf.mxu0 }
 0x2ad   : > { %v1107_v26 = vadd.f32 %v2966_v24, %v1106_v25 }
 0x2ae   : > { %v3261_v27 = vpop.f32.mrf.mxu0 }
 0x2af   : > { %v4345_v28 = vpack.c.bf16 %v1107_v26, %v1107_v26 }
 0x2b0   : > { %v1109_v29 = vpop.f32.mrf.mxu0 }
 0x2b1   : > { %1144 = vst.msk [vmem:[#allocation4] sm:$0xf] %vm1123_vm1, %v4345_v28  ;;  %v1110_v30 = vadd.f32 %v2966_v24, %v1109_v29 }
 0x2b2   : > { %v3262_v31 = vpop.f32.mrf.mxu0 }
 0x2b3   : > { %v4349_v32 = vpack.c.bf16 %v1110_v30, %v1110_v30 }
 0x2b5   : > { %1145 = vst.msk [vmem:[#allocation4 + $0x4] sm:$0xf] %vm1123_vm1, %v4349_v32 }
 0x2bc   : > { %v3500_v59 = vld [vmem:[#allocation4] sm:$0xff]  }
 0x303   : > { %v1156_v33 = vpop.permute.xlu0 %1155 }
 0x304   : > { %1162 = vst.msk [vmem:[#allocation3 + $0x8] sm:$0xf] %vm1123_vm1, %v1156_v33 }
 0x305   : > { %v1147_v36 = vpop.permute.xlu1 %1146 }
 0x306   : > { %1153 = vst.msk [vmem:[#allocation2 + $0x8] sm:$0xf] %vm1123_vm1, %v1147_v36 }
 0x307   : > { %v1183_v37 = vpop.permute.xlu0 %1182 }
 0x308   : > { %1189 = vst.msk [vmem:[#allocation3 + $0x10] sm:$0xf] %vm1123_vm1, %v1183_v37 }
 0x309   : > { %v1158_v38 = vpop.permute.xlu1 %1157 }
 0x30a   : > { %1163 = vst.msk [vmem:[#allocation3 + $0xc] sm:$0xf] %vm1123_vm1, %v1158_v38 }
 0x30b   : > { %v1174_v41 = vpop.permute.xlu0 %1173 }
 0x30c   : > { %1180 = vst.msk [vmem:[#allocation2 + $0x10] sm:$0xf] %vm1123_vm1, %v1174_v41 }
 0x30d   : > { %v1185_v42 = vpop.permute.xlu1 %1184 }
 0x30e   : > { %1190 = vst.msk [vmem:[#allocation3 + $0x14] sm:$0xf] %vm1123_vm1, %v1185_v42 }
 0x30f   : > { %v1210_v43 = vpop.permute.xlu0 %1209 }
 0x310   : > { %1216 = vst.msk [vmem:[#allocation3 + $0x18] sm:$0xf] %vm1123_vm1, %v1210_v43 }
 0x311   : > { %v1149_v44 = vpop.permute.xlu1 %1148  ;;  %v3494_v45 = vld [vmem:[#allocation3 + $0x8] sm:$0xff]  }
 0x312   : > { %1154 = vst.msk [vmem:[#allocation2 + $0xc] sm:$0xf] %vm1123_vm1, %v1149_v44  ;;  %v1322_v48 = vsel %vm1260_vm2, %v3494_v45, 0 }
 0x313   : > { %v1201_v46 = vpop.permute.xlu0 %1200  ;;  %3270 = vmatpush3.bf16.xpose.msra.mxu1 %v1322_v48 }
 0x314   : > { %1207 = vst.msk [vmem:[#allocation2 + $0x18] sm:$0xf] %vm1123_vm1, %v1201_v46  ;;  %3275 = vmatprep.subr.bf16.mxu1 %v3941_v11 }
 0x315   : > { %v1176_v49 = vpop.permute.xlu1 %1175  ;;  %v3496_v50 = vld [vmem:[#allocation3 + $0x10] sm:$0xff]  }
 0x316   : > { %1181 = vst.msk [vmem:[#allocation2 + $0x14] sm:$0xf] %vm1123_vm1, %v1176_v49  ;;  %v1379_v53 = vsel %vm1260_vm2, %v3496_v50, 0 }
 0x319   : > { %v1212_v51 = vpop.permute.xlu1 %1211  ;;  %v3495_v52 = vld [vmem:[#allocation2 + $0x8] sm:$0xff]  }
 0x31a   : > { %1217 = vst.msk [vmem:[#allocation3 + $0x1c] sm:$0xf] %vm1123_vm1, %v1212_v51  ;;  %3272 = vmatmul.mubr.msk.bf16.vlgmr.msra.gmra.mxu1 %vm1260_vm2, %v3495_v52 }
 0x31b   : > { %3276 = vmatpush3.bf16.xpose.msra.mxu1 %v1379_v53  ;;  %3277 = vmatprep.mubr.msk.bf16.mxu1 %vm3942_vm0, %v3941_v11 }
 0x31c   : > { %3281 = vmatprep.subr.bf16.mxu1 %v3941_v11 }
 0x31d   : > { %v1203_v54 = vpop.permute.xlu1 %1202  ;;  %v3497_v55 = vld [vmem:[#allocation2 + $0x10] sm:$0xff]  }
 0x31e   : > { %1208 = vst.msk [vmem:[#allocation2 + $0x1c] sm:$0xf] %vm1123_vm1, %v1203_v54 }
 0x321   : > { %v3498_v56 = vld [vmem:[#allocation3 + $0x18] sm:$0xff]  }
 0x322   : > { %3278 = vmatmul.mubr.msk.bf16.vlgmr.msra.gmra.mxu1 %vm1260_vm2, %v3497_v55  ;;  %v1436_v57 = vsel %vm1260_vm2, %v3498_v56, 0 }
 0x323   : > { %3282 = vmatpush3.bf16.xpose.msra.mxu1 %v1436_v57  ;;  %3283 = vmatprep.mubr.msk.bf16.mxu1 %vm3942_vm0, %v3941_v11 }
 0x324   : > { %3287 = vmatprep.subr.bf16.mxu1 %v3941_v11 }
 0x325   : > { %v3499_v58 = vld [vmem:[#allocation2 + $0x18] sm:$0xff]  }
 0x32a   : > { %3284 = vmatmul.mubr.msk.bf16.vlgmr.msra.gmra.mxu1 %vm1260_vm2, %v3499_v58 }
 0x32b   : > { %3288 = vmatpush3.bf16.msra.mxu1 %v3500_v59  ;;  %3289 = vmatprep.mubr.msk.bf16.mxu1 %vm3942_vm0, %v3941_v11 }
 0x32c   : > { %3293 = vmatprep.subr.bf16.mxu1 %v3941_v11 }
 0x365   : > { %v1301_v60 = vpop.f32.mrf.mxu1 }
 0x366   : > { %v1480_v61 = vsel %vm1479_vm3, %v1301_v60, -inf }
 0x367   : > { %1481 = vmax.xlane.f32.xlu0 %v1480_v61  ;;  %v3267_v62 = vpop.f32.mrf.mxu1 }
 0x369   : > { %v1304_v63 = vpop.f32.mrf.mxu1 }
 0x36a   : > { %v1483_v0 = vsel %vm1479_vm3, %v1304_v63, -inf }
 0x36b   : > { %1484 = vmax.xlane.f32.xlu1 %v1483_v0  ;;  %v3268_v1 = vpop.f32.mrf.mxu1 }
 0x3da   : > { %v1358_v2 = vpop.f32.mrf.mxu1 }
 0x3db   : > { %v1486_v3 = vsel %vm1479_vm3, %v1358_v2, -inf }
 0x3dc   : > { %1487 = vmax.xlane.f32.xlu0 %v1486_v3  ;;  %v3273_v4 = vpop.f32.mrf.mxu1 }
 0x3de   : > { %v1361_v5 = vpop.f32.mrf.mxu1 }
 0x3df   : > { %v1489_v6 = vsel %vm1479_vm3, %v1361_v5, -inf }
 0x3e0   : > { %1490 = vmax.xlane.f32.xlu0 %v1489_v6  ;;  %v3274_v7 = vpop.f32.mrf.mxu1 }
 0x3e2   : > { %v1415_v8 = vpop.f32.mrf.mxu1 }
 0x3e3   : > { %v1492_v9 = vsel %vm1479_vm3, %v1415_v8, -inf }
 0x3e4   : > { %1493 = vmax.xlane.f32.xlu0 %v1492_v9  ;;  %v3279_v10 = vpop.f32.mrf.mxu1 }
 0x3e6   : > { %v1418_v12 = vpop.f32.mrf.mxu1 }
 0x3e7   : > { %v1495_v13 = vsel %vm1479_vm3, %v1418_v12, -inf }
 0x3e8   : > { %1496 = vmax.xlane.f32.xlu1 %v1495_v13  ;;  %v3280_v14 = vpop.f32.mrf.mxu1 }
 0x3ea   : > { %v1472_v15 = vpop.f32.mrf.mxu1 }
 0x3eb   : > { %v1498_v16 = vsel %vm1479_vm3, %v1472_v15, -inf }
 0x3ec   : > { %1499 = vmax.xlane.f32.xlu0 %v1498_v16  ;;  %v3285_v17 = vpop.f32.mrf.mxu1 }
 0x3ee   : > { %v1475_v18 = vpop.f32.mrf.mxu1 }
 0x3ef   : > { %v1501_v19 = vsel %vm1479_vm3, %v1475_v18, -inf }
 0x3f0   : > { %1502 = vmax.xlane.f32.xlu1 %v1501_v19  ;;  %v3286_v20 = vpop.f32.mrf.mxu1  ;;  %v1482_v21 = vpop.xlane.xlu0 %1481 }
 0x3f1   : > { %v1504_v22 = vsub.f32 %v1301_v60, %v1482_v21 }
 0x3f3   : > { %v1512_v23 = vmul.f32 1.442695, %v1504_v22 }
 0x3f4   : > { %v1485_v24 = vpop.xlane.xlu1 %1484 }
 0x3f5   : > { %3597 = vpow2.f32 %v1512_v23  ;;  %v1505_v25 = vsub.f32 %v1304_v63, %v1485_v24 }
 0x3f7   : > { %v1514_v26 = vmul.f32 1.442695, %v1505_v25 }
 0x3f9   : > { %3599 = vpow2.f32 %v1514_v26 }
 0x401   : > { %1166 = vrot.lane.b32.xlu1 %v4349_v32, %s3943_s8 }
 0x402   : > { %1164 = vrot.lane.b32.xlu0 %v4345_v28, %s3943_s8  ;;  %v4397_v27 = vpop.eup %3597 }
 0x403   : > { %v1528_v29 = vsel %vm1479_vm3, %v4397_v27, 0.0 }
 0x405   : > { %1191 = vrot.lane.b32.xlu1 %v4345_v28, %s3944_s14 }
 0x406   : > { %v3600_v30 = vpop.eup %3599 }
 0x407   : > { %v1531_v31 = vsel %vm1479_vm3, %v3600_v30, 0.0 }
 0x409   : > { %1193 = vrot.lane.b32.xlu1 %v4349_v32, %s3944_s14 }
 0x421   : > { %1529 = vadd.xlane.f32.xlu0 %v1528_v29 }
 0x42d   : > { %1532 = vadd.xlane.f32.xlu1 %v1531_v31 }
 0x465   : > { %v1488_v33 = vpop.xlane.xlu0 %1487 }
 0x466   : > { %v1506_v36 = vsub.f32 %v1358_v2, %v1488_v33 }
 0x468   : > { %v1516_v37 = vmul.f32 1.442695, %v1506_v36 }
 0x469   : > { %v1491_v38 = vpop.xlane.xlu0 %1490 }
 0x46a   : > { %3601 = vpow2.f32 %v1516_v37  ;;  %v1507_v41 = vsub.f32 %v1361_v5, %v1491_v38 }
 0x46c   : > { %v1518_v42 = vmul.f32 1.442695, %v1507_v41 }
 0x46d   : > { %v1494_v43 = vpop.xlane.xlu0 %1493 }
 0x46e   : > { %3603 = vpow2.f32 %v1518_v42  ;;  %v1508_v44 = vsub.f32 %v1415_v8, %v1494_v43 }
 0x470   : > { %v1520_v45 = vmul.f32 1.442695, %v1508_v44 }
 0x471   : > { %v1497_v46 = vpop.xlane.xlu1 %1496 }
 0x472   : > { %3605 = vpow2.f32 %v1520_v45  ;;  %v1509_v48 = vsub.f32 %v1418_v12, %v1497_v46  ;;  %v3504_v46 = vld [vmem:[#allocation14 + $0x38] sm:$0xff]  }
 0x473   : > { %3312 = vmatpush3.bf16.msra.mxu0 %v3504_v46 }
 0x474   : > { %v1522_v49 = vmul.f32 1.442695, %v1509_v48  ;;  %3313 = vmatprep.subr.bf16.mxu0 %v3941_v11 }
 0x475   : > { %v1500_v50 = vpop.xlane.xlu0 %1499 }
 0x476   : > { %3607 = vpow2.f32 %v1522_v49  ;;  %v1510_v51 = vsub.f32 %v1472_v15, %v1500_v50 }
 0x477   : > { %v3602_v52 = vpop.eup %3601 }
 0x478   : > { %v1524_v53 = vmul.f32 1.442695, %v1510_v51  ;;  %v1534_v54 = vsel %vm1479_vm3, %v3602_v52, 0.0 }
 0x479   : > { %v1503_v55 = vpop.xlane.xlu1 %1502  ;;  %1535 = vadd.xlane.f32.xlu0 %v1534_v54  ;;  %v1165_v56 = vpop.permute.xlu0 %1164  ;;  %v3505_v54 = vld [vmem:[#allocation14 + $0x30] sm:$0xff]  }
 0x47a   : > { %3609 = vpow2.f32 %v1524_v53  ;;  %v1511_v57 = vsub.f32 %v1475_v18, %v1503_v55  ;;  %1171 = vst.msk [vmem:[#allocation4 + $0x8] sm:$0xf] %vm1123_vm1, %v1165_v56  ;;  %3314 = vmatpush3.bf16.msra.mxu0 %v3505_v54  ;;  %v3506_v55 = vld [vmem:[#allocation14 + $0x28] sm:$0xff]   ;;  %v3507_v56 = vld [vmem:[#allocation14 + $0x20] sm:$0xff]  }
 0x47b   : > { %v3604_v58 = vpop.eup %3603  ;;  %3315 = vmatprep.subr.bf16.mxu0 %v3941_v11  ;;  %v3524_v54 = vld [vmem:[#allocation15 + $0xcc] ss:$16 sps:$4 sm:$0xff]  }
 0x47c   : > { %v1526_v59 = vmul.f32 1.442695, %v1511_v57  ;;  %v1537_v60 = vsel %vm1479_vm3, %v3604_v58, 0.0 }
 0x47d   : > { %1538 = vadd.xlane.f32.xlu1 %v1537_v60  ;;  %v1167_v61 = vpop.permute.xlu1 %1166  ;;  %v3508_v60 = vld [vmem:[#allocation14 + $0x18] sm:$0xff]  }
 0x47e   : > { %3611 = vpow2.f32 %v1526_v59  ;;  %1172 = vst.msk [vmem:[#allocation4 + $0xc] sm:$0xf] %vm1123_vm1, %v1167_v61  ;;  %3316 = vmatpush3.bf16.msra.mxu0 %v3506_v55  ;;  %v3519_v55 = vld [vmem:[#allocation15 + $0xc0] ss:$16 sps:$4 sm:$0xff]  }
 0x47f   : > { %v3606_v62 = vpop.eup %3605  ;;  %3317 = vmatprep.subr.bf16.mxu0 %v3941_v11 }
 0x480   : > { %v1540_v63 = vsel %vm1479_vm3, %v3606_v62, 0.0 }
 0x481   : > { %1541 = vadd.xlane.f32.xlu0 %v1540_v63  ;;  %v1192_v0 = vpop.permute.xlu1 %1191 }
 0x482   : > { %1198 = vst.msk [vmem:[#allocation4 + $0x10] sm:$0xf] %vm1123_vm1, %v1192_v0  ;;  %3318 = vmatpush3.bf16.msra.mxu0 %v3507_v56  ;;  %v3509_v0 = vld [vmem:[#allocation14 + $0x10] sm:$0xff]   ;;  %v3522_v56 = vld [vmem:[#allocation15 + $0xc8] ss:$16 sps:$4 sm:$0xff]  }
 0x483   : > { %v3608_v1 = vpop.eup %3607  ;;  %3319 = vmatprep.subr.bf16.mxu0 %v3941_v11 }
 0x484   : > { %v1543_v2 = vsel %vm1479_vm3, %v3608_v1, 0.0 }
 0x485   : > { %1544 = vadd.xlane.f32.xlu1 %v1543_v2  ;;  %v1194_v3 = vpop.permute.xlu1 %1193  ;;  %v3501_v16 = vld [vmem:[#allocation4 + $0x8] sm:$0xff]  }
 0x486   : > { %1199 = vst.msk [vmem:[#allocation4 + $0x14] sm:$0xf] %vm1123_vm1, %v1194_v3  ;;  %3320 = vmatpush3.bf16.msra.mxu0 %v3508_v60  ;;  %v3528_v60 = vld [vmem:[#allocation15 + $0xa8] ss:$16 sps:$4 sm:$0xff]  }
 0x487   : > { %v3610_v4 = vpop.eup %3609  ;;  %3321 = vmatprep.subr.bf16.mxu0 %v3941_v11 }
 0x488   : > { %v1546_v5 = vsel %vm1479_vm3, %v3610_v4, 0.0 }
 0x489   : > { %1547 = vadd.xlane.f32.xlu0 %v1546_v5 }
 0x48a   : > { %3322 = vmatpush3.bf16.msra.mxu0 %v3509_v0  ;;  %v3534_v0 = vld [vmem:[#allocation15 + $0x88] ss:$16 sps:$4 sm:$0xff]  }
 0x48b   : > { %v3612_v6 = vpop.eup %3611  ;;  %3323 = vmatprep.subr.bf16.mxu0 %v3941_v11 }
 0x48c   : > { %v1549_v7 = vsel %vm1479_vm3, %v3612_v6, 0.0 }
 0x48d   : > { %1550 = vadd.xlane.f32.xlu1 %v1549_v7 }
 0x49e   : > { %1220 = vrot.lane.b32.xlu1 %v4349_v32, %s3945_s16 }
 0x49f   : > { %1218 = vrot.lane.b32.xlu0 %v4345_v28, %s3945_s16 }
 0x4aa   : > { %v1530_v8 = vpop.xlane.xlu0 %1529 }
 0x4ab   : > { %3613 = vrcp.f32 %v1530_v8 }
 0x4b6   : > { %v1533_v9 = vpop.xlane.xlu1 %1532 }
 0x4b7   : > { %3615 = vrcp.f32 %v1533_v9 }
 0x4b8   : > { %v3614_v10 = vpop.eup %3613 }
 0x4b9   : > { %v1560_v13 = vmul.f32 %v3614_v10, %v4397_v27  ;;  %v3502_v27 = vld [vmem:[#allocation4 + $0x10] sm:$0xff]  }
 0x4c4   : > { %v3616_v12 = vpop.eup %3615 }
 0x4c5   : > { %v1561_v14 = vmul.f32 %v3616_v12, %v3600_v30 }
 0x4c7   : > { %v1568_v15 = vpack.c.bf16 %v1561_v14, %v1560_v13 }
 0x4c9   : > { %3290 = vmatmul.mubr.msk.bf16.vlgmr.msra.gmra.mxu1 %vm1479_vm3, %v1568_v15 }
 0x4ca   : > { %3294 = vmatpush3.bf16.msra.mxu1 %v3501_v16  ;;  %3295 = vmatprep.mubr.msk.bf16.mxu1 %vm3942_vm0, %v3941_v11 }
 0x4cb   : > { %3299 = vmatprep.subr.bf16.mxu1 %v3941_v11 }
 0x502   : > { %v1536_v28 = vpop.xlane.xlu0 %1535 }
 0x503   : > { %3617 = vrcp.f32 %v1536_v28 }
 0x506   : > { %v1539_v32 = vpop.xlane.xlu1 %1538 }
 0x507   : > { %3619 = vrcp.f32 %v1539_v32 }
 0x50a   : > { %v1542_v17 = vpop.xlane.xlu0 %1541 }
 0x50b   : > { %3621 = vrcp.f32 %v1542_v17 }
 0x50e   : > { %v1545_v18 = vpop.xlane.xlu1 %1544 }
 0x50f   : > { %3623 = vrcp.f32 %v1545_v18 }
 0x510   : > { %v3618_v19 = vpop.eup %3617 }
 0x511   : > { %v1562_v22 = vmul.f32 %v3618_v19, %v3602_v52 }
 0x512   : > { %v1548_v20 = vpop.xlane.xlu0 %1547 }
 0x513   : > { %3625 = vrcp.f32 %v1548_v20  ;;  %v1958_v20 = vsub.s32 2, %v4277_v34 }
 0x514   : > { %v3620_v21 = vpop.eup %3619 }
 0x515   : > { %v1563_v23 = vmul.f32 %v3620_v21, %v3604_v58  ;;  %v3009_v21 = vld [vmem:[%s4601_s11] ss:$0 sm:$0xff] }
 0x516   : > { %v1219_v24 = vpop.permute.xlu0 %1218  ;;  %v1551_v25 = vpop.xlane.xlu1 %1550 }
 0x517   : > { %1225 = vst.msk [vmem:[#allocation4 + $0x18] sm:$0xf] %vm1123_vm1, %v1219_v24  ;;  %3627 = vrcp.f32 %v1551_v25  ;;  %v1569_v26 = vpack.c.bf16 %v1563_v23, %v1562_v22  ;;  %v1959_v22 = vrot.slane %v4280_v35, %v1958_v20 }
 0x518   : > { %v3622_v29 = vpop.eup %3621 }
 0x519   : > { %3296 = vmatmul.mubr.msk.bf16.vlgmr.msra.gmra.mxu1 %vm1479_vm3, %v1569_v26  ;;  %v1564_v33 = vmul.f32 %v3622_v29, %v3606_v62  ;;  %v1228_v26 = vld [vmem:[%s4220_s1] sm:$0xff] }
 0x51a   : > { %3300 = vmatpush3.bf16.msra.mxu1 %v3502_v27  ;;  %v1221_v30 = vpop.permute.xlu1 %1220  ;;  %3301 = vmatprep.mubr.msk.bf16.mxu1 %vm3942_vm0, %v3941_v11 }
 0x51b   : > { %1226 = vst.msk [vmem:[#allocation4 + $0x1c] sm:$0xf] %vm1123_vm1, %v1221_v30  ;;  %3305 = vmatprep.subr.bf16.mxu1 %v3941_v11 }
 0x51c   : > { %v3624_v31 = vpop.eup %3623 }
 0x51d   : > { %v1565_v36 = vmul.f32 %v3624_v31, %v3608_v1 }
 0x51f   : > { %v1570_v37 = vpack.c.bf16 %v1565_v36, %v1564_v33  ;;  %v1229_v36 = vld [vmem:[%s4220_s1 + $0x8] sm:$0xff] }
 0x520   : > { %v3626_v38 = vpop.eup %3625 }
 0x521   : > { %3302 = vmatmul.mubr.msk.bf16.vlgmr.msra.gmra.mxu1 %vm1479_vm3, %v1570_v37  ;;  %v1566_v43 = vmul.f32 %v3626_v38, %v3610_v4  ;;  %v3510_v4 = vld [vmem:[#allocation14 + $0x8] sm:$0xff]  }
 0x522   : > { %v3503_v41 = vld [vmem:[#allocation4 + $0x18] sm:$0xff]   ;;  %3307 = vmatprep.mubr.msk.bf16.mxu1 %vm3942_vm0, %v3941_v11  ;;  %3324 = vmatpush3.bf16.msra.mxu0 %v3510_v4  ;;  %v3540_v4 = vld [vmem:[#allocation15 + $0x68] ss:$16 sps:$4 sm:$0xff]  }
 0x523   : > { %3306 = vmatpush3.bf16.msra.mxu1 %v3503_v41  ;;  %3325 = vmatprep.subr.bf16.mxu0 %v3941_v11 }
 0x524   : > { %v3628_v42 = vpop.eup %3627 }
 0x525   : > { %v1567_v44 = vmul.f32 %v3628_v42, %v3612_v6  ;;  %v3511_v6 = vld [vmem:[#allocation14] sm:$0xff]  }
 0x526   : > { %3326 = vmatpush3.bf16.msra.mxu0 %v3511_v6  ;;  %v3548_v6 = vld [vmem:[#allocation15 + $0x4c] ss:$16 sps:$4 sm:$0xff]  }
 0x527   : > { %v1571_v45 = vpack.c.bf16 %v1567_v44, %v1566_v43 }
 0x529   : > { %3308 = vmatmul.mubr.msk.bf16.vlgmr.msra.gmra.mxu1 %vm1479_vm3, %v1571_v45 }
 0x589   : > { %v1623_v48 = vpop.f32.mrf.mxu1 }
 0x58a   : > { %v3098_v49 = vpack.c.bf16 %v1623_v48, %v1623_v48 }
 0x58b   : > { %v3291_v50 = vpop.f32.mrf.mxu1 }
 0x58c   : > { %1789 = vst.msk [vmem:[#allocation5] sm:$0xf] %vm1123_vm1, %v3098_v49  ;;  %v3515_v49 = vld [vmem:[#allocation15 + $0xe4] ss:$16 sps:$4 sm:$0xff]   ;;  %v3518_v50 = vld [vmem:[#allocation15 + $0xec] ss:$16 sps:$4 sm:$0xff]  }
 0x58d   : > { %v1626_v51 = vpop.f32.mrf.mxu1  ;;  %2233 = vmatprep.subr.bf16.mxu1 %v3515_v49  ;;  %2276 = vmatprep.subr.bf16.mxu0 %v3518_v50 }
 0x58e   : > { %v3099_v52 = vpack.c.bf16 %v1626_v51, %v1626_v51  ;;  %v3513_v51 = vld [vmem:[#allocation15 + $0xe0] ss:$16 sps:$4 sm:$0xff]  }
 0x58f   : > { %v3292_v53 = vpop.f32.mrf.mxu1  ;;  %2234 = vmatpush1.bf16.msra.mxu1 %v3513_v51 }
 0x590   : > { %1790 = vst.msk [vmem:[#allocation5 + $0x4] sm:$0xf] %vm1123_vm1, %v3099_v52  ;;  %v3516_v52 = vld [vmem:[#allocation15 + $0xe8] ss:$16 sps:$4 sm:$0xff]   ;;  %v3521_v53 = vld [vmem:[#allocation15 + $0xc4] ss:$16 sps:$4 sm:$0xff]  }
 0x591   : > { %2235 = vmatprep.subr.bf16.mxu1 %v3521_v53  ;;  %v3564_v53 = vld [vmem:[#allocation17 + $0xb8] sm:$0xff]  }
 0x593   : > { %2236 = vmatpush1.bf16.msra.mxu1 %v3519_v55  ;;  %v3566_v55 = vld [vmem:[#allocation17 + $0xf0] sm:$0xff]  }
 0x5d9   : > { %v1673_v57 = vpop.f32.mrf.mxu1 }
 0x5da   : > { %v3100_v58 = vpack.c.bf16 %v1673_v57, %v1673_v57  ;;  %v3527_v57 = vld [vmem:[#allocation15 + $0xa4] ss:$16 sps:$4 sm:$0xff]  }
 0x5db   : > { %v3297_v59 = vpop.f32.mrf.mxu1  ;;  %2237 = vmatprep.subr.bf16.mxu1 %v3527_v57  ;;  %v3568_v57 = vld [vmem:[#allocation17 + $0xb0] sm:$0xff]  }
 0x5dc   : > { %1797 = vrot.lane.b32.xlu0 %v3100_v58, %s3945_s16  ;;  %v3530_v58 = vld [vmem:[#allocation15 + $0xac] ss:$16 sps:$4 sm:$0xff]   ;;  %v3525_v59 = vld [vmem:[#allocation15 + $0xa0] ss:$16 sps:$4 sm:$0xff]  }
 0x5dd   : > { %v1676_v61 = vpop.f32.mrf.mxu1  ;;  %2238 = vmatpush1.bf16.msra.mxu1 %v3525_v59  ;;  %v3570_v59 = vld [vmem:[#allocation17 + $0xe8] sm:$0xff]  }
 0x5de   : > { %v3101_v62 = vpack.c.bf16 %v1676_v61, %v1676_v61  ;;  %v3533_v61 = vld [vmem:[#allocation15 + $0x84] ss:$16 sps:$4 sm:$0xff]  }
 0x5df   : > { %v3298_v63 = vpop.f32.mrf.mxu1  ;;  %2239 = vmatprep.subr.bf16.mxu1 %v3533_v61  ;;  %v3572_v61 = vld [vmem:[#allocation17 + $0xa8] sm:$0xff]  }
 0x5e0   : > { %1799 = vrot.lane.b32.xlu1 %v3101_v62, %s3945_s16  ;;  %v3536_v62 = vld [vmem:[#allocation15 + $0x8c] ss:$16 sps:$4 sm:$0xff]   ;;  %v3531_v63 = vld [vmem:[#allocation15 + $0x80] ss:$16 sps:$4 sm:$0xff]   ;;  %s4657_s16 = sld [smem:[#allocation38_spill]] }
 0x5e1   : > { %v1723_v1 = vpop.f32.mrf.mxu1  ;;  %2240 = vmatpush1.bf16.msra.mxu1 %v3531_v63  ;;  %v3574_v63 = vld [vmem:[#allocation17 + $0xe0] sm:$0xff]  }
 0x5e2   : > { %v3102_v2 = vpack.c.bf16 %v1723_v1, %v1723_v1  ;;  %v3539_v1 = vld [vmem:[#allocation15 + $0x64] ss:$16 sps:$4 sm:$0xff]  }
 0x5e3   : > { %v3303_v3 = vpop.f32.mrf.mxu1  ;;  %2241 = vmatprep.subr.bf16.mxu1 %v3539_v1  ;;  %v3576_v1 = vld [vmem:[#allocation17 + $0xa0] sm:$0xff]  }
 0x5e4   : > { %1812 = vrot.lane.b32.xlu0 %v3102_v2, %s3944_s14  ;;  %v3542_v2 = vld [vmem:[#allocation15 + $0x6c] ss:$16 sps:$4 sm:$0xff]   ;;  %v3537_v3 = vld [vmem:[#allocation15 + $0x60] ss:$16 sps:$4 sm:$0xff]  }
 0x5e5   : > { %v1726_v5 = vpop.f32.mrf.mxu1  ;;  %2242 = vmatpush1.bf16.msra.mxu1 %v3537_v3  ;;  %v3578_v3 = vld [vmem:[#allocation17 + $0xd8] sm:$0xff]  }
 0x5e6   : > { %v3103_v7 = vpack.c.bf16 %v1726_v5, %v1726_v5  ;;  %v3545_v5 = vld [vmem:[#allocation15 + $0x44] ss:$16 sps:$4 sm:$0xff]  }
 0x5e7   : > { %v3304_v8 = vpop.f32.mrf.mxu1  ;;  %2243 = vmatprep.subr.bf16.mxu1 %v3545_v5  ;;  %v3580_v5 = vld [vmem:[#allocation17 + $0x98] sm:$0xff]  }
 0x5e8   : > { %1814 = vrot.lane.b32.xlu1 %v3103_v7, %s3944_s14  ;;  %v3543_v7 = vld [vmem:[#allocation15 + $0x40] ss:$16 sps:$4 sm:$0xff]   ;;  %v3546_v8 = vld [vmem:[#allocation15 + $0x48] ss:$16 sps:$4 sm:$0xff]  }
 0x5e9   : > { %v1773_v9 = vpop.f32.mrf.mxu1  ;;  %2244 = vmatpush1.bf16.msra.mxu1 %v3543_v7  ;;  %v3582_v7 = vld [vmem:[#allocation17 + $0xd0] sm:$0xff]  }
 0x5ea   : > { %v3104_v10 = vpack.c.bf16 %v1773_v9, %v1773_v9  ;;  %v3551_v9 = vld [vmem:[#allocation15 + $0x24] ss:$16 sps:$4 sm:$0xff]  }
 0x5eb   : > { %v3309_v12 = vpop.f32.mrf.mxu1  ;;  %2245 = vmatprep.subr.bf16.mxu1 %v3551_v9  ;;  %v3584_v9 = vld [vmem:[#allocation17 + $0x90] sm:$0xff]  }
 0x5ec   : > { %1827 = vrot.lane.b32.xlu0 %v3104_v10, %s3943_s8  ;;  %v3554_v10 = vld [vmem:[#allocation15 + $0x2c] ss:$16 sps:$4 sm:$0xff]   ;;  %v3549_v12 = vld [vmem:[#allocation15 + $0x20] ss:$16 sps:$4 sm:$0xff]  }
 0x5ed   : > { %v1776_v13 = vpop.f32.mrf.mxu1  ;;  %2246 = vmatpush1.bf16.msra.mxu1 %v3549_v12  ;;  %v3586_v12 = vld [vmem:[#allocation17 + $0xc8] sm:$0xff]  }
 0x5ee   : > { %v3105_v14 = vpack.c.bf16 %v1776_v13, %v1776_v13  ;;  %v3552_v13 = vld [vmem:[#allocation15 + $0x28] ss:$16 sps:$4 sm:$0xff]  }
 0x5ef   : > { %v3310_v15 = vpop.f32.mrf.mxu1 }
 0x5f0   : > { %1829 = vrot.lane.b32.xlu1 %v3105_v14, %s3943_s8  ;;  %v3557_v14 = vld [vmem:[#allocation15 + $0x4] ss:$16 sps:$4 sm:$0xff]   ;;  %v3560_v15 = vld [vmem:[#allocation15 + $0xc] ss:$16 sps:$4 sm:$0xff]  }
 0x5f1   : > { %2247 = vmatprep.subr.bf16.mxu1 %v3557_v14  ;;  %v3588_v14 = vld [vmem:[#allocation17 + $0x88] sm:$0xff]  }
 0x64e   : > { %v1798_v16 = vpop.permute.xlu0 %1797 }
 0x64f   : > { %1804 = vst.msk [vmem:[#allocation5] sm:$0xf] %vm1803_vm4, %v1798_v16  ;;  %v3946_v16 = vmov 0  }
 0x650   : > { %2265 = vmatprep.mubr.bf16.mxu1 %v3946_v16 }
 0x652   : > { %v1800_v28 = vpop.permute.xlu1 %1799 }
 0x653   : > { %1805 = vst.msk [vmem:[#allocation5 + $0x4] sm:$0xf] %vm1803_vm4, %v1800_v28  ;;  %v3555_v28 = vld [vmem:[#allocation15] ss:$16 sps:$4 sm:$0xff]  }
 0x654   : > { %2248 = vmatpush1.bf16.msra.mxu1 %v3555_v28  ;;  %v3591_v28 = vld [vmem:[#allocation17] sm:$0xff]  }
 0x656   : > { %v1813_v11 = vpop.permute.xlu0 %1812 }
 0x657   : > { %1819 = vst.msk [vmem:[#allocation5] sm:$0xf] %vm1818_vm5, %v1813_v11  ;;  %v3558_v11 = vld [vmem:[#allocation15 + $0x8] ss:$16 sps:$4 sm:$0xff]  }
 0x65a   : > { %v1815_v32 = vpop.permute.xlu1 %1814 }
 0x65b   : > { %1820 = vst.msk [vmem:[#allocation5 + $0x4] sm:$0xf] %vm1818_vm5, %v1815_v32 }
 0x65e   : > { %v1828_v17 = vpop.permute.xlu0 %1827 }
 0x65f   : > { %1834 = vst.msk [vmem:[#allocation5] sm:$0xf] %vm1833_vm6, %v1828_v17 }
 0x662   : > { %v1830_v18 = vpop.permute.xlu1 %1829 }
 0x663   : > { %1835 = vst.msk [vmem:[#allocation5 + $0x4] sm:$0xf] %vm1833_vm6, %v1830_v18 }
 0x66a   : > { %v3512_v19 = vld [vmem:[#allocation5] sm:$0xff]  }
 0x66b   : > { %3328 = vmatmul.mubr.bf16.vlgmr.msra.gmra.mxu0 %v3512_v19 }
 0x66c   : > { %2277 = vmatpush1.bf16.msra.mxu0 %v3516_v52  ;;  %2308 = vmatprep.mubr.bf16.mxu0 %v3946_v16  ;;  %v3562_v52 = vld [vmem:[#allocation17 + $0xf8] sm:$0xff]   ;;  %v3590_v16 = vld [vmem:[#allocation17 + $0xc0] sm:$0xff]  }
 0x66d   : > { %2278 = vmatprep.subr.bf16.mxu0 %v3524_v54  ;;  %v3565_v54 = vld [vmem:[#allocation17 + $0x70] sm:$0xff]  }
 0x670   : > { %2279 = vmatpush1.bf16.msra.mxu0 %v3522_v56  ;;  %v3567_v56 = vld [vmem:[#allocation17 + $0x30] sm:$0xff]  }
 0x671   : > { %2280 = vmatprep.subr.bf16.mxu0 %v3530_v58  ;;  %v3569_v58 = vld [vmem:[#allocation17 + $0x68] sm:$0xff]  }
 0x674   : > { %2281 = vmatpush1.bf16.msra.mxu0 %v3528_v60  ;;  %v3571_v60 = vld [vmem:[#allocation17 + $0x28] sm:$0xff]  }
 0x675   : > { %2282 = vmatprep.subr.bf16.mxu0 %v3536_v62  ;;  %v3573_v62 = vld [vmem:[#allocation17 + $0x60] sm:$0xff]  }
 0x678   : > { %2283 = vmatpush1.bf16.msra.mxu0 %v3534_v0  ;;  %v3575_v0 = vld [vmem:[#allocation17 + $0x20] sm:$0xff]  }
 0x679   : > { %2284 = vmatprep.subr.bf16.mxu0 %v3542_v2  ;;  %v3577_v2 = vld [vmem:[#allocation17 + $0x58] sm:$0xff]  }
 0x67c   : > { %2285 = vmatpush1.bf16.msra.mxu0 %v3540_v4  ;;  %v3579_v4 = vld [vmem:[#allocation17 + $0x18] sm:$0xff]  }
 0x67d   : > { %2286 = vmatprep.subr.bf16.mxu0 %v3548_v6  ;;  %v3581_v6 = vld [vmem:[#allocation17 + $0x50] sm:$0xff]  }
 0x680   : > { %2287 = vmatpush1.bf16.msra.mxu0 %v3546_v8  ;;  %v3583_v8 = vld [vmem:[#allocation17 + $0x10] sm:$0xff]  }
 0x681   : > { %2288 = vmatprep.subr.bf16.mxu0 %v3554_v10  ;;  %v3585_v10 = vld [vmem:[#allocation17 + $0x48] sm:$0xff]  }
 0x684   : > { %2289 = vmatpush1.bf16.msra.mxu0 %v3552_v13  ;;  %v3587_v13 = vld [vmem:[#allocation17 + $0x8] sm:$0xff]  }
 0x685   : > { %2290 = vmatprep.subr.bf16.mxu0 %v3560_v15  ;;  %v3589_v15 = vld [vmem:[#allocation17 + $0x40] sm:$0xff]  }
 0x688   : > { %2291 = vmatpush1.bf16.msra.mxu0 %v3558_v11  ;;  %v3592_v11 = vld [vmem:[#allocation17 + $0x80] sm:$0xff]  }
 0x689   : > { %3181 = vmatprep.subr.bf16.mxu0 %v3562_v52 }
 0x72b   : > { %v1949_v23 = vpop.f32.mrf.mxu0 }
 0x72c   : > { %v1950_v24 = vadd.f32 %v3009_v21, %v1949_v23 }
 0x72d   : > { %v3329_v25 = vpop.f32.mrf.mxu0 }
 0x72e   : > { %v1960_v27 = vmul.f32 %v1959_v22, %v1950_v24  ;;  %v3019_v24 = vld [vmem:[%s4654_s18] ss:$0 sm:$0xff]  ;;  %s4539_s18 = scalar_lea.hbm %s4658_s2, %s3106_s26 }
 0x72f   : > { %v1952_v29 = vpop.f32.mrf.mxu0 }
 0x730   : > { %v1953_v30 = vadd.f32 %v3009_v21, %v1952_v29  ;;  %v4454_v31 = vadd.f32 %v1960_v27, %v1228_v26  ;;  %v2008_v26 = vsub.s32 4, %v4277_v34  ;;  %v3020_v27 = vld [vmem:[%s4655_s10] ss:$0 sm:$0xff]  ;;  %s3840_s10 = scalar_lea.vmem %s3839_s6, 512 }
 0x731   : > { %v3330_v33 = vpop.f32.mrf.mxu0  ;;  %p3842_p7 = scmp.lt.s32.totalorder %s3840_s10, %s3834_s0 }
 0x732   : > { %v1961_v37 = vmul.f32 %v1959_v22, %v1953_v30  ;;  %1966 = vadd.xlane.f32.xlu0 %v4454_v31 }
 0x733   : > { %p3843_p13 = por %p3842_p7, %p3841_p0 }
 0x734   : > { %v4458_v38 = vadd.f32 %v1961_v37, %v1229_v36  ;;  %v2009_v37 = vrot.slane %v4287_v39, %v2008_v26  ;;  %v3563_v39 = vld [vmem:[#allocation17 + $0x38] sm:$0xff]  }
 0x735   : > { %p3844_p2 = pnand %p3843_p13, %p3837_p10 }
 0x736   : > { %1968 = vadd.xlane.f32.xlu1 %v4458_v38 }
 0x7bb   : > { %v1967_v41 = vpop.xlane.xlu0 %1966 }
 0x7bc   : > { %v1971_v35 = vmul.f32 0.0078125, %v1967_v41  ;;  %v2014_v41 = vsub.s32 3, %v4277_v34 }
 0x7be   : > { %v4462_v42 = vsub.f32 %v4454_v31, %v1971_v35 }
 0x7bf   : > { %v1969_v43 = vpop.xlane.xlu1 %1968 }
 0x7c0   : > { %v1972_v44 = vmul.f32 0.0078125, %v1969_v43  ;;  %v1975_v45 = vmul.f32 %v4462_v42, %v4462_v42 }
 0x7c2   : > { %v4467_v46 = vsub.f32 %v4458_v38, %v1972_v44  ;;  %1977 = vadd.xlane.f32.xlu0 %v1975_v45  ;;  %v4483_v45 = vld [vmem:[%s4275_s4] sm:$0x3f] }
 0x7c4   : > { %v1976_v48 = vmul.f32 %v4467_v46, %v4467_v46 }
 0x7c6   : > { %1979 = vadd.xlane.f32.xlu0 %v1976_v48 }
 0x84b   : > { %v1978_v32 = vpop.xlane.xlu0 %1977 }
 0x84c   : > { %v1981_v17 = vmul.f32 0.0078125, %v1978_v32  ;;  %v2051_v32 = vld [vmem:[%s4656_s23] sm:$0xf] }
 0x84e   : > { %v1983_v18 = vadd.f32 1e-05, %v1981_v17  ;;  %v2056_v17 = vrot.slane %v2051_v32, %v772_v47 }
 0x84f   : > { %v1980_v19 = vpop.xlane.xlu0 %1979 }
 0x850   : > { %3629 = vrsqrt.f32 %v1983_v18  ;;  %v1982_v21 = vmul.f32 0.0078125, %v1980_v19  ;;  %v2064_v18 = vrot.slane %v2051_v32, %v1958_v20  ;;  %v2060_v19 = vrot.slane %v2051_v32, %v766_v40 }
 0x852   : > { %v1984_v22 = vadd.f32 1e-05, %v1982_v21  ;;  %v2068_v21 = vrot.slane %v2051_v32, %v2014_v41 }
 0x854   : > { %3631 = vrsqrt.f32 %v1984_v22 }
 0x85d   : > { %v3630_v23 = vpop.eup %3629 }
 0x85e   : > { %v1987_v25 = vmul.f32 %v3630_v23, %v4462_v42  ;;  %v2015_v42 = vrot.slane %v4483_v45, %v2014_v41 }
 0x860   : > { %v1995_v29 = vmul.f32 %v3019_v24, %v1987_v25 }
 0x861   : > { %v3632_v30 = vpop.eup %3631 }
 0x862   : > { %v1988_v33 = vmul.f32 %v3632_v30, %v4467_v46  ;;  %v2003_v36 = vadd.f32 %v3020_v27, %v1995_v29  ;;  %v3561_v46 = vld [vmem:[#allocation17 + $0x78] sm:$0xff]  }
 0x863   : > { %3159 = vmatprep.subr.bf16.mxu1 %v3561_v46 }
 0x864   : > { %v1996_v35 = vmul.f32 %v3019_v24, %v1988_v33  ;;  %v2010_v44 = vmul.f32 %v2009_v37, %v2003_v36 }
 0x866   : > { %v2004_v43 = vadd.f32 %v3020_v27, %v1996_v35  ;;  %v2016_v49 = vadd.f32 %v2015_v42, %v2010_v44 }
 0x868   : > { %v2011_v48 = vmul.f32 %v2009_v37, %v2004_v43 }
 0x86a   : > { %v2017_v50 = vadd.f32 %v2015_v42, %v2011_v48 }
 0x86c   : > { %v2018_v51 = vpack.c.bf16 %v2017_v50, %v2016_v49 }
 0x86e   : > { %2266 = vmatmul.mubr.bf16.vlgmr.msra.gmra.mxu1 %v2018_v51  ;;  %2309 = vmatmul.mubr.bf16.vlgmr.msra.gmra.mxu0 %v2018_v51 }
 0x86f   : > { %3160 = vmatpush3.bf16.msra.mxu1 %v3563_v39  ;;  %3182 = vmatpush3.bf16.msra.mxu0 %v3564_v53 }
 0x870   : > { %3161 = vmatprep.subr.bf16.mxu1 %v3565_v54  ;;  %3183 = vmatprep.subr.bf16.mxu0 %v3566_v55 }
 0x873   : > { %3162 = vmatpush3.bf16.msra.mxu1 %v3567_v56  ;;  %3184 = vmatpush3.bf16.msra.mxu0 %v3568_v57 }
 0x874   : > { %3163 = vmatprep.subr.bf16.mxu1 %v3569_v58  ;;  %3185 = vmatprep.subr.bf16.mxu0 %v3570_v59 }
 0x877   : > { %3164 = vmatpush3.bf16.msra.mxu1 %v3571_v60  ;;  %3186 = vmatpush3.bf16.msra.mxu0 %v3572_v61 }
 0x878   : > { %3165 = vmatprep.subr.bf16.mxu1 %v3573_v62  ;;  %3187 = vmatprep.subr.bf16.mxu0 %v3574_v63 }
 0x87b   : > { %3166 = vmatpush3.bf16.msra.mxu1 %v3575_v0  ;;  %3188 = vmatpush3.bf16.msra.mxu0 %v3576_v1 }
 0x87c   : > { %3167 = vmatprep.subr.bf16.mxu1 %v3577_v2  ;;  %3189 = vmatprep.subr.bf16.mxu0 %v3578_v3 }
 0x87f   : > { %3168 = vmatpush3.bf16.msra.mxu1 %v3579_v4  ;;  %3190 = vmatpush3.bf16.msra.mxu0 %v3580_v5 }
 0x880   : > { %3169 = vmatprep.subr.bf16.mxu1 %v3581_v6  ;;  %3191 = vmatprep.subr.bf16.mxu0 %v3582_v7 }
 0x883   : > { %3170 = vmatpush3.bf16.msra.mxu1 %v3583_v8  ;;  %3192 = vmatpush3.bf16.msra.mxu0 %v3584_v9 }
 0x884   : > { %3171 = vmatprep.subr.bf16.mxu1 %v3585_v10  ;;  %3193 = vmatprep.subr.bf16.mxu0 %v3586_v12 }
 0x887   : > { %3172 = vmatpush3.bf16.msra.mxu1 %v3587_v13  ;;  %3194 = vmatpush3.bf16.msra.mxu0 %v3588_v14 }
 0x888   : > { %3173 = vmatprep.subr.bf16.mxu1 %v3589_v15  ;;  %3195 = vmatprep.subr.bf16.mxu0 %v3590_v16 }
 0x88b   : > { %3174 = vmatpush3.bf16.msra.mxu1 %v3591_v28  ;;  %3196 = vmatpush3.bf16.msra.mxu0 %v3592_v11 }
 0x92e   : > { %v2267_v22 = vpop.f32.mrf.mxu1  ;;  %v2310_v23 = vpop.f32.mrf.mxu0 }
 0x92f   : > { %v4499_v24 = vadd.f32 %v2267_v22, %v2056_v17  ;;  %v4501_v25 = vadd.f32 %v2310_v23, %v2064_v18 }
 0x930   : > { %v2269_v26 = vpop.f32.mrf.mxu1  ;;  %v2312_v27 = vpop.f32.mrf.mxu0 }
 0x931   : > { %v2327_v29 = vmul.f32 0.044715, %v4499_v24  ;;  %v2329_v47 = vmul.f32 0.044715, %v4501_v25  ;;  %v2270_v30 = vadd.f32 %v2269_v26, %v2060_v19  ;;  %v4505_v20 = vadd.f32 %v2312_v27, %v2068_v21 }
 0x932   : > { %v2271_v33 = vpop.f32.mrf.mxu1  ;;  %v2314_v40 = vpop.f32.mrf.mxu0 }
 0x933   : > { %v2335_v36 = vmul.f32 %v2327_v29, %v4499_v24  ;;  %v2337_v37 = vmul.f32 %v2329_v47, %v4501_v25  ;;  %v2328_v41 = vmul.f32 0.044715, %v2270_v30  ;;  %v2330_v35 = vmul.f32 0.044715, %v4505_v20 }
 0x934   : > { %v2272_v43 = vadd.f32 %v2271_v33, %v2056_v17  ;;  %v4510_v44 = vadd.f32 %v2314_v40, %v2064_v18  ;;  %v2273_v42 = vpop.f32.mrf.mxu1  ;;  %v2316_v48 = vpop.f32.mrf.mxu0  ;;  %v2320_v26 = vmul.f32 0.5, %v2270_v30  ;;  %v2319_v29 = vmul.f32 0.5, %v4499_v24 }
 0x935   : > { %v2343_v49 = vmul.f32 %v2335_v36, %v4499_v24  ;;  %v2345_v50 = vmul.f32 %v2337_v37, %v4501_v25  ;;  %v2336_v51 = vmul.f32 %v2328_v41, %v2270_v30  ;;  %v2338_v46 = vmul.f32 %v2330_v35, %v4505_v20 }
 0x936   : > { %v2331_v52 = vmul.f32 0.044715, %v2272_v43  ;;  %v2333_v39 = vmul.f32 0.044715, %v4510_v44  ;;  %v2274_v53 = vadd.f32 %v2273_v42, %v2060_v19  ;;  %v2317_v54 = vadd.f32 %v2316_v48, %v2068_v21 }
 0x937   : > { %v2351_v55 = vadd.f32 %v2343_v49, %v4499_v24  ;;  %v2353_v56 = vadd.f32 %v2345_v50, %v4501_v25  ;;  %v2344_v57 = vmul.f32 %v2336_v51, %v2270_v30  ;;  %v2346_v58 = vmul.f32 %v2338_v46, %v4505_v20 }
 0x938   : > { %v2339_v59 = vmul.f32 %v2331_v52, %v2272_v43  ;;  %v2341_v60 = vmul.f32 %v2333_v39, %v4510_v44  ;;  %v2332_v61 = vmul.f32 0.044715, %v2274_v53  ;;  %v2334_v62 = vmul.f32 0.044715, %v2317_v54 }
 0x939   : > { %v2359_v63 = vmul.f32 0.7978846, %v2351_v55  ;;  %v2361_v0 = vmul.f32 0.7978846, %v2353_v56  ;;  %v2352_v1 = vadd.f32 %v2344_v57, %v2270_v30  ;;  %v2354_v7 = vadd.f32 %v2346_v58, %v4505_v20 }
 0x93a   : > { %v2347_v2 = vmul.f32 %v2339_v59, %v2272_v43  ;;  %v2349_v3 = vmul.f32 %v2341_v60, %v4510_v44  ;;  %v2340_v4 = vmul.f32 %v2332_v61, %v2274_v53  ;;  %v2342_v5 = vmul.f32 %v2334_v62, %v2317_v54 }
 0x93b   : > { %v2360_v6 = vmul.f32 0.7978846, %v2352_v1  ;;  %3633 = vtanh.f32 %v2359_v63  ;;  %v2362_v13 = vmul.f32 0.7978846, %v2354_v7  ;;  %v2323_v36 = vmul.f32 0.5, %v2272_v43 }
 0x93c   : > { %v2355_v8 = vadd.f32 %v2347_v2, %v2272_v43  ;;  %v2357_v9 = vadd.f32 %v2349_v3, %v4510_v44  ;;  %v2348_v10 = vmul.f32 %v2340_v4, %v2274_v53  ;;  %3635 = vtanh.f32 %v2361_v0 }
 0x93d   : > { %v2350_v12 = vmul.f32 %v2342_v5, %v2317_v54  ;;  %3637 = vtanh.f32 %v2360_v6  ;;  %v2324_v42 = vmul.f32 0.5, %v2274_v53  ;;  %v2325_v49 = vmul.f32 0.5, %v4510_v44 }
 0x93e   : > { %v2363_v14 = vmul.f32 0.7978846, %v2355_v8  ;;  %v2365_v15 = vmul.f32 0.7978846, %v2357_v9  ;;  %v2356_v16 = vadd.f32 %v2348_v10, %v2274_v53  ;;  %3639 = vtanh.f32 %v2362_v13 }
 0x93f   : > { %v2358_v28 = vadd.f32 %v2350_v12, %v2317_v54  ;;  %v2322_v51 = vmul.f32 0.5, %v4505_v20  ;;  %v2326_v46 = vmul.f32 0.5, %v2317_v54  ;;  %v2321_v24 = vmul.f32 0.5, %v4501_v25  ;;  %v3053_v25 = vld [vmem:[%s4657_s16] ss:$0 sm:$0xff] }
 0x940   : > { %3641 = vtanh.f32 %v2363_v14  ;;  %v2364_v11 = vmul.f32 0.7978846, %v2356_v16  ;;  %v2742_v62 = vsub.s32 5, %v4277_v34 }
 0x941   : > { %3643 = vtanh.f32 %v2365_v15  ;;  %v2366_v32 = vmul.f32 0.7978846, %v2358_v28 }
 0x942   : > { %3645 = vtanh.f32 %v2364_v11  ;;  %v2743_v5 = vrot.slane %v4483_v45, %v2742_v62 }
 0x943   : > { %3647 = vtanh.f32 %v2366_v32 }
 0x948   : > { %v3634_v17 = vpop.eup %3633 }
 0x949   : > { %v3636_v18 = vpop.eup %3635  ;;  %v2375_v37 = vadd.f32 1.0, %v3634_v17 }
 0x94a   : > { %v3638_v19 = vpop.eup %3637  ;;  %v2377_v50 = vadd.f32 1.0, %v3636_v18 }
 0x94b   : > { %v3640_v21 = vpop.eup %3639  ;;  %v2376_v27 = vadd.f32 1.0, %v3638_v19  ;;  %v2383_v58 = vmul.f32 %v2375_v37, %v2319_v29 }
 0x94c   : > { %v2378_v40 = vadd.f32 1.0, %v3640_v21  ;;  %v2385_v60 = vmul.f32 %v2377_v50, %v2321_v24 }
 0x94d   : > { %v3642_v22 = vpop.eup %3641  ;;  %v2384_v39 = vmul.f32 %v2376_v27, %v2320_v26 }
 0x94e   : > { %v3644_v23 = vpop.eup %3643  ;;  %v2379_v47 = vadd.f32 1.0, %v3642_v22  ;;  %v2386_v57 = vmul.f32 %v2378_v40, %v2322_v51 }
 0x94f   : > { %v3646_v33 = vpop.eup %3645  ;;  %v2381_v41 = vadd.f32 1.0, %v3644_v23 }
 0x950   : > { %v3648_v35 = vpop.eup %3647  ;;  %v2380_v48 = vadd.f32 1.0, %v3646_v33  ;;  %v2387_v30 = vmul.f32 %v2379_v47, %v2323_v36 }
 0x951   : > { %v2382_v52 = vadd.f32 1.0, %v3648_v35  ;;  %v2389_v56 = vmul.f32 %v2381_v41, %v2325_v49 }
 0x952   : > { %v2388_v55 = vmul.f32 %v2380_v48, %v2324_v42  ;;  %v2391_v61 = vpack.c.bf16 %v2387_v30, %v2383_v58 }
 0x953   : > { %v2390_v43 = vmul.f32 %v2382_v52, %v2326_v46  ;;  %v2393_v44 = vpack.c.bf16 %v2389_v56, %v2385_v60 }
 0x954   : > { %v2392_v59 = vpack.c.bf16 %v2388_v55, %v2384_v39 }
 0x955   : > { %v2394_v53 = vpack.c.bf16 %v2390_v43, %v2386_v57 }
 0x956   : > { %2690 = vmatprep.mubr.bf16.mxu1 %v2392_v59 }
 0x957   : > { %2731 = vmatprep.mubr.bf16.mxu0 %v2394_v53  ;;  %2691 = vmatmul.mubr.bf16.vlgmr.msra.gmra.mxu1 %v2391_v61 }
 0x958   : > { %2732 = vmatmul.mubr.bf16.vlgmr.msra.gmra.mxu0 %v2393_v44 }
 0xa17   : > { %v3175_v20 = vpop.f32.mrf.mxu1 }
 0xa18   : > { %v3197_v54 = vpop.f32.mrf.mxu0 }
 0xa19   : > { %v3176_v63 = vpop.f32.mrf.mxu1 }
 0xa1a   : > { %v3177_v0 = vadd.f32 %v3176_v63, %v3175_v20  ;;  %v3198_v1 = vpop.f32.mrf.mxu0 }
 0xa1b   : > { %v3178_v2 = vpop.f32.mrf.mxu1  ;;  %v3199_v4 = vadd.f32 %v3198_v1, %v3197_v54 }
 0xa1c   : > { %v2693_v3 = vadd.f32 %v3177_v0, %v3053_v25  ;;  %v3200_v6 = vpop.f32.mrf.mxu0 }
 0xa1d   : > { %v3179_v7 = vpop.f32.mrf.mxu1 }
 0xa1e   : > { %v2734_v8 = vadd.f32 %v3199_v4, %v2693_v3  ;;  %v3180_v9 = vadd.f32 %v3179_v7, %v3178_v2  ;;  %v3201_v34 = vpop.f32.mrf.mxu0 }
 0xa1f   : > { %v3202_v13 = vadd.f32 %v3201_v34, %v3200_v6 }
 0xa20   : > { %v2744_v10 = vmul.f32 %v2743_v5, %v2734_v8  ;;  %v2696_v12 = vadd.f32 %v3180_v9, %v3053_v25 }
 0xa22   : > { %v2746_v14 = vadd.f32 %v2744_v10, %v4454_v31  ;;  %v2737_v15 = vadd.f32 %v3202_v13, %v2696_v12 }
 0xa24   : > { %2748 = vst [vmem:[%s707_s20] sm:$0xff] %v2746_v14  ;;  %v2745_v16 = vmul.f32 %v2743_v5, %v2737_v15 }
 0xa26   : > { %v2747_v45 = vadd.f32 %v2745_v16, %v4458_v38 }
 0xa28   : > { %2749 = vst [vmem:[%s707_s20 + $0x8] sm:$0xff] %v2747_v45 }
 0xa29   : > { %3847 = shalt.err (!%p3844_p2)
}
 0xa2a   : > { %s3848_s4 = scalar_lea.hbm %s4539_s18, 256  ;;  %s3852_s8 = scalar_lea.hbm %s4658_s2, 512 }
 0xa2b   : > { %p3849_p9 = scmp.ne.s32.totalorder %s4539_s18, %s3848_s4  ;;  %p3853_p12 = scmp.lt.s32.totalorder %s4539_s18, %s4658_s2 }
 0xa2c   : > { %p3854_p4 = scmp.lt.s32.totalorder %s3852_s8, %s3848_s4 }
 0xa2d   : > { %p3850_p6 = pnand %p3849_p9, %p4184_p11 }
 0xa2e   : > { %p3855_p1 = por %p3854_p4, %p3853_p12 }
 0xa2f   : > { %p3851_p8 = pneg %p3850_p6 }
 0xa31   : > { %p3856_p3 = pnand %p3855_p1, %p3851_p8 }
 0xa33   : > { %3859 = shalt.err (!%p3856_p3)
}
 0xa34   : > { %s3948_s20 = smov 128   ;;  %s3949_s26 = smov 8  }
 0xa35   : > { %3357 = dma.vmem_to_hbm [thread:$0]  (%p4184_p11), %s4541_s21, 256, %s4539_s18, %s2751_s13, %s3948_s20, %s3948_s20, %s3949_s26  }
 0xa36 PF: > { %s2781_s15 = sand.u32 1, %s3906_s27   ;;  %p4659_p5 = scmp.ne.s32.totalorder %s4649_s25, 0 }
 0xa37   : > { %p4660_p10 = scmp.ge.s32.totalorder %s3926_s19, 2  ;;  %s2782_s1 = scalar_lea.sflag [#allocation8], %s2781_s15 }
 0xa39   : > { %p3383_p0 = pnand %p4660_p10, %p4659_p5 }
 0xa3b   : > { %p3384_p7 = pneg %p3383_p0 }
 0xa3d   : > { %3901 = dma.done.wait (%p3384_p7), %s2782_s1, 256  }
 0xa3e   : > { %3903 = vsyncadd (%p3384_p7), %s2782_s1, 4294967040  ;;  %s37_s19 = sadd.s32 1, %s3926_s19   ;;  %s4661_s30 = sld [smem:[#allocation24_spill]] }
 0xa3f   : > { %p34_p13 = scmp.ge.s32.totalorder %s37_s19, 4   ;;  %s4662_s0 = sld [smem:[#allocation25_spill]] }
 0xa40   : > { %s4663_s27 = smov %s3910_s28  ;;  %s4664_s28 = smov %s3914_s29 }
 0xa41   : > { %s4665_s29 = smov %s4189_s12  ;;  %36 = sbr.rel (!%p34_p13) target bundleno = 24 (0x18), region = 179 }
 0xa46   :  { %2787 = vsyncpa [#allocation7], 1 }
 0xa47   :  { %2789 = vsyncpa [#allocation7 + $0x1], 1 }
 0xa48   :  { %2790 = vsyncpa [#allocation10], 1 }
 0xa49   :  { %2791 = vsyncpa [#allocation13], 1 }
 0xa4a   :  { %2792 = vsyncpa [#allocation16], 1 }
 0xa4b   :  { %2793 = vsyncpa [#allocation8], 1 }
 0xa4c   :  { %2795 = vsyncpa [#allocation8 + $0x1], 1 }

</bundles_post_ra>
